<compile_context>
chip_gen: v5e
topology: v5e:2x2
jax: 0.10.0
libtpu: 0.0.40
codegen_flags: <defaults>
</compile_context>

<pallas_src>
import functools

import jax
import jax.numpy as jnp
from jax.experimental import pallas as pl
from jax.experimental.pallas import tpu as pltpu


def _round_up(x, m):
    return ((x + m - 1) // m) * m


def _choose_head_block(num_heads, per_head_weight_bytes,
                       budget_bytes=12 * 1024 * 1024):
    """Largest head-block size Hb that divides the head count and keeps the
    double-buffered streamed weights (2 * Hb * bytes/head) under the budget,
    which is safe on every generation (v7x has only 64 MiB physical VMEM)."""
    hb = 1
    for cand in (2, 4, 8, 16, 32):
        if (num_heads % cand == 0
                and 2 * cand * per_head_weight_bytes <= budget_bytes):
            hb = cand
    return hb


def _film_heads_kernel(z_ref, wst_ref, bs_ref, w_ref, br_ref, o_ref, *, hb):
    """One grid step == `hb` FiLM heads (gamma/beta processors).

    z_ref   : (Bp, Zp)         bf16  task embedding            (resident)
    wst_ref : (Zp, Fp)         bf16  shared weight, (in, out)  (resident)
    bs_ref  : (1, Fp)          f32   shared bias               (resident)
    w_ref   : (hb, 3, Fp, Fp)  bf16  per-head DRL weights      (streamed)
    br_ref  : (hb, 4, Fp)      f32   rows 0..2 = DRL biases, row 3 = FiLM reg
    o_ref   : (hb, Bp, Fp)     f32   head outputs
    """
    # Shared layer h = relu(z @ Ws^T + bs).  Recomputed once per grid step
    # (Bp x Zp x Fp MACs -- negligible) so every step is independent.
    h = jnp.dot(z_ref[...], wst_ref[...], preferred_element_type=jnp.float32)
    h = jnp.maximum(h + bs_ref[...], 0.0)
    h16 = h.astype(jnp.bfloat16)

    for j in range(hb):  # static unroll over the heads of this block
        b = br_ref[j]    # (4, Fp) f32

        # DenseResidual -> ReLU -> DenseResidual -> ReLU -> DenseResidual.
        # bf16 operands on the MXU, f32 accumulation, f32 bias + residual.
        y = jnp.dot(h16, w_ref[j, 0], preferred_element_type=jnp.float32)
        y = jnp.maximum(y + b[0:1] + h, 0.0)
        y2 = jnp.dot(y.astype(jnp.bfloat16), w_ref[j, 1],
                     preferred_element_type=jnp.float32)
        y = jnp.maximum(y2 + b[1:2] + y, 0.0)
        y3 = jnp.dot(y.astype(jnp.bfloat16), w_ref[j, 2],
                     preferred_element_type=jnp.float32)
        y = y3 + b[2:3] + y

        # FiLM epilogue on the VPU: gamma = y*reg + 1, beta = y*reg.  Heads
        # are ordered (gamma, beta, gamma, beta, ...) so parity decides the
        # +1 shift; with an even hb the parity is a compile-time constant.
        if hb % 2 == 0:
            shift = 1.0 if (j % 2 == 0) else 0.0
        else:
            head_idx = pl.program_id(0) * hb + j
            shift = jnp.where((head_idx % 2) == 0, 1.0, 0.0)
        o_ref[j] = (y * b[3:4] + shift).astype(o_ref.dtype)


def prepare_film_params(params):
    """One-time parameter preparation, hoisted out of the hot forward path.

    Pads to the minimal TPU grain (multiples of 8 only -- the kernel is
    memory-bound, so the contraction/feature dims are NOT inflated to 128),
    pre-transposes every weight to (in, out) MXU layout, casts the large
    streamed weights to bfloat16 and packs biases + FiLM regularizers into a
    single small streamed array per head.

    Returns (prepared, meta):
      prepared : list (per layer) of dicts of device arrays
      meta     : tuple (per layer) of (num_maps, num_blocks) -- static info
    """
    bf16, f32 = jnp.bfloat16, jnp.float32
    prepared, meta = [], []
    for lp in params:
        F, Z = lp['shared_w'].shape
        NB = lp['w'].shape[0]
        P = NB * 4
        Fp = _round_up(F, 8)
        Zp = _round_up(Z, 8)

        wst = jnp.zeros((Zp, Fp), bf16).at[:Z, :F].set(
            lp['shared_w'].T.astype(bf16))
        bs = jnp.zeros((1, Fp), f32).at[0, :F].set(lp['shared_b'].astype(f32))

        head_w = lp['w'].reshape(P, 3, F, F)            # torch (out, in)
        w = jnp.zeros((P, 3, Fp, Fp), bf16).at[:, :, :F, :F].set(
            jnp.swapaxes(head_w, -1, -2).astype(bf16))  # -> (in, out)

        head_b = lp['b'].reshape(P, 3, F)
        head_reg = lp['reg'].reshape(P, F)
        br = jnp.zeros((P, 4, Fp), f32)
        br = br.at[:, 0:3, :F].set(head_b.astype(f32))
        br = br.at[:, 3, :F].set(head_reg.astype(f32))

        prepared.append(dict(wst=wst, bs=bs, w=w, br=br))
        meta.append((int(F), int(NB)))
    return prepared, tuple(meta)


def _film_layer_heads(z_pad, batch, num_maps, layer_params):
    """All FiLM heads of ONE target layer in a single fused pallas_call."""
    wst, bs, w, br = (layer_params['wst'], layer_params['bs'],
                      layer_params['w'], layer_params['br'])
    Bp, Zp = z_pad.shape
    P, _, Fp, _ = w.shape
    hb = _choose_head_block(P, 3 * Fp * Fp * 2)   # bf16 weight bytes per head

    kernel = functools.partial(_film_heads_kernel, hb=hb)
    out = pl.pallas_call(
        kernel,
        out_shape=jax.ShapeDtypeStruct((P, Bp, Fp), jnp.float32),
        grid_spec=pl.GridSpec(
            grid=(P // hb,),
            in_specs=[
                # Resident across all grid steps (constant index_map).
                pl.BlockSpec((Bp, Zp), lambda p: (0, 0)),
                pl.BlockSpec((Zp, Fp), lambda p: (0, 0)),
                pl.BlockSpec((1, Fp), lambda p: (0, 0)),
                # Streamed per head block, double-buffered by the pipeline.
                pl.BlockSpec((hb, 3, Fp, Fp), lambda p: (p, 0, 0, 0)),
                pl.BlockSpec((hb, 4, Fp), lambda p: (p, 0, 0)),
            ],
            out_specs=pl.BlockSpec((hb, Bp, Fp), lambda p: (p, 0, 0)),
        ),
        compiler_params=pltpu.CompilerParams(
            # Head blocks are fully independent -> shardable across the two
            # TensorCores of a v7x chip (no-op on v5e/v6e).
            # TODO(synk): confirm megacore sharding in a v7x profile; switch
            # to an explicit core split if both cores run the full grid.
            dimension_semantics=("parallel",),
            # Streamed-weight double buffers are capped at ~24 MiB by
            # _choose_head_block; 48 MiB keeps headroom under v7x's 64 MiB
            # physical VMEM while letting large-F layers keep full blocks.
            vmem_limit_bytes=48 * 1024 * 1024,
        ),
    )(z_pad, wst, bs, w, br)

    # NOTE: padded batch rows (batch..Bp) and padded feature lanes
    # (num_maps..Fp) contain garbage (relu(bias) propagated through the DRLs,
    # +1 gamma shift on padded lanes); they are sliced away here and any
    # future change to this slicing must keep doing so.
    return out[:, :batch, :num_maps]


@functools.partial(jax.jit, static_argnums=2)
def film_adaptation_forward(z, prepared, meta):
    """FilmAdaptationNetwork.forward (no_film=False).

    z        : (B, Z) float task representation (shared across layers).
    prepared : output of prepare_film_params (padded / transposed / bf16).
    meta     : static per-layer (num_maps, num_blocks).
    Returns  : list (per target layer) of list (per block) of dicts with keys
               'gamma1','beta1','gamma2','beta2', each of shape (B, num_maps).
    """
    B, Z = z.shape
    Bp = _round_up(B, 8)
    Zp = prepared[0]['wst'].shape[0]
    # Only z is padded/cast in the hot path; all weight prep is cached.
    z_pad = jnp.zeros((Bp, Zp), jnp.bfloat16).at[:B, :Z].set(
        z.astype(jnp.bfloat16))

    outputs = []
    for lp, (num_maps, num_blocks) in zip(prepared, meta):
        heads = _film_layer_heads(z_pad, B, num_maps, lp)   # (P, B, F)
        layer_out = []
        for blk in range(num_blocks):
            base = blk * 4
            layer_out.append({
                'gamma1': heads[base + 0],
                'beta1': heads[base + 1],
                'gamma2': heads[base + 2],
                'beta2': heads[base + 3],
            })
        outputs.append(layer_out)
    return outputs


# ---------------------------------------------------------------------------
# Deterministic parameter construction + pure-JAX reference
# ---------------------------------------------------------------------------

def init_params(key, num_maps_per_layer, num_blocks_per_layer, z_g_dim):
    params = []
    for num_maps, num_blocks in zip(num_maps_per_layer, num_blocks_per_layer):
        key, k1, k2, k3, k4, k5 = jax.random.split(key, 6)
        bound_s = 1.0 / (z_g_dim ** 0.5)
        shared_w = jax.random.uniform(k1, (num_maps, z_g_dim), jnp.float32,
                                      -bound_s, bound_s)
        shared_b = jax.random.uniform(k2, (num_maps,), jnp.float32,
                                      -bound_s, bound_s)
        bound = 1.0 / (num_maps ** 0.5)
        w = jax.random.uniform(k3, (num_blocks, 4, 3, num_maps, num_maps),
                               jnp.float32, -bound, bound)
        b = jax.random.uniform(k4, (num_blocks, 4, 3, num_maps),
                               jnp.float32, -bound, bound)
        # Scale 0.1 (instead of CNAPs' 0.001 init) only to make the numerical
        # smoke test below meaningful; the forward semantics are scale-free.
        reg = 0.1 * jax.random.normal(k5, (num_blocks, 4, num_maps),
                                      jnp.float32)
        params.append(dict(shared_w=shared_w, shared_b=shared_b,
                           w=w, b=b, reg=reg))
    return params


def ref_forward(z, params):
    names = (('gamma1', True), ('beta1', False), ('gamma2', True),
             ('beta2', False))
    outs = []
    for lp in params:
        h = jax.nn.relu(z @ lp['shared_w'].T + lp['shared_b'])
        nb = lp['w'].shape[0]
        layer_out = []
        for blk in range(nb):
            d = {}
            for hi, (name, is_g) in enumerate(names):
                w3 = lp['w'][blk, hi]
                b3 = lp['b'][blk, hi]
                reg = lp['reg'][blk, hi]
                y = h
                y = jax.nn.relu(y @ w3[0].T + b3[0] + y)
                y = jax.nn.relu(y @ w3[1].T + b3[1] + y)
                y = y @ w3[2].T + b3[2] + y
                d[name] = y * reg + (1.0 if is_g else 0.0)
            layer_out.append(d)
        outs.append(layer_out)
    return outs


if __name__ == "__main__":
    # Small shapes consistent with a FiLM adaptation net over a 2-layer base.
    num_maps_per_layer = [64, 128]
    num_blocks_per_layer = [1, 2]
    z_g_dim = 64
    batch = 2

    key = jax.random.PRNGKey(0)
    kz, kp = jax.random.split(key)
    z = jax.random.normal(kz, (batch, z_g_dim), jnp.float32)
    params = init_params(kp, num_maps_per_layer, num_blocks_per_layer, z_g_dim)

    # One-time weight preparation (hoisted out of the hot path), then the
    # jitted fused forward.
    prepared, meta = prepare_film_params(params)
    prepared = jax.block_until_ready(prepared)

    out = film_adaptation_forward(z, prepared, meta)
    out = jax.block_until_ready(out)

    # Pure-JAX reference at full f32 matmul precision.  The kernel streams
    # bf16 weights/activations (f32 accumulation), so tolerances are relaxed
    # relative to an all-f32 comparison.
    with jax.default_matmul_precision("highest"):
        ref = jax.block_until_ready(ref_forward(z, params))

    for layer_out, layer_ref in zip(out, ref):
        for blk_out, blk_ref in zip(layer_out, layer_ref):
            for name in ('gamma1', 'beta1', 'gamma2', 'beta2'):
                assert blk_out[name].shape == blk_ref[name].shape, name
                assert jnp.allclose(blk_out[name], blk_ref[name],
                                    atol=5e-3, rtol=2.5e-2), name

    print("KERNEL_OK")
</pallas_src>

<mosaic_0001>
module attributes {stable_mosaic.version = 11 : i64} {
  func.func @_film_heads_kernel(%arg0: i32, %arg1: memref<8x64xbf16, #tpu.memory_space<vmem>>, %arg2: memref<64x64xbf16, #tpu.memory_space<vmem>>, %arg3: memref<1x64xf32, #tpu.memory_space<vmem>>, %arg4: memref<4x3x64x64xbf16, #tpu.memory_space<vmem>>, %arg5: memref<4x4x64xf32, #tpu.memory_space<vmem>>, %arg6: memref<4x8x64xf32, #tpu.memory_space<vmem>>) attributes {dimension_semantics = [#tpu.dimension_semantics<parallel>], iteration_bounds = array<i64: 1>, scalar_prefetch = 0 : i64, scratch_operands = 0 : i64, tpu.core_type = #tpu.core_type<tc>, window_params = [{pipeline_mode = #tpu.pipeline_mode<synchronous>, transform_indices = @transform_0, window_bounds = array<i64: 8, 64>}, {pipeline_mode = #tpu.pipeline_mode<synchronous>, transform_indices = @transform_1, window_bounds = array<i64: 64, 64>}, {pipeline_mode = #tpu.pipeline_mode<synchronous>, transform_indices = @transform_2, window_bounds = array<i64: 1, 64>}, {transform_indices = @transform_3, window_bounds = array<i64: 4, 3, 64, 64>}, {transform_indices = @transform_4, window_bounds = array<i64: 4, 4, 64>}, {transform_indices = @transform_5, window_bounds = array<i64: 4, 8, 64>}]} {
    %c0 = arith.constant 0 : index
    %c0_0 = arith.constant 0 : index
    %0 = vector.load %arg1[%c0, %c0_0] : memref<8x64xbf16, #tpu.memory_space<vmem>>, vector<8x64xbf16>
    %c0_1 = arith.constant 0 : index
    %c0_2 = arith.constant 0 : index
    %1 = vector.load %arg2[%c0_1, %c0_2] : memref<64x64xbf16, #tpu.memory_space<vmem>>, vector<64x64xbf16>
    %cst = arith.constant dense<0.000000e+00> : vector<8x64xf32>
    %2 = tpu.matmul %0, %1, %cst {dimension_numbers = #tpu.dot_dimension_numbers<[1], [0], [0], [1], [0, 0, 1, 1], [], []>} : vector<8x64xbf16>, vector<64x64xbf16>, vector<8x64xf32> -> vector<8x64xf32>
    %c0_3 = arith.constant 0 : index
    %c0_4 = arith.constant 0 : index
    %3 = vector.load %arg3[%c0_3, %c0_4] : memref<1x64xf32, #tpu.memory_space<vmem>>, vector<1x64xf32>
    %4 = vector.broadcast %3 : vector<1x64xf32> to vector<8x64xf32>
    %5 = arith.addf %2, %4 : vector<8x64xf32>
    %cst_5 = arith.constant 0.000000e+00 : f32
    %6 = vector.broadcast %cst_5 : f32 to vector<8x64xf32>
    %7 = arith.maximumf %5, %6 : vector<8x64xf32>
    %8 = arith.truncf %7 : vector<8x64xf32> to vector<8x64xbf16>
    %c0_6 = arith.constant 0 : index
    %c0_7 = arith.constant 0 : index
    %c0_8 = arith.constant 0 : index
    %9 = vector.load %arg5[%c0_6, %c0_7, %c0_8] : memref<4x4x64xf32, #tpu.memory_space<vmem>>, vector<1x4x64xf32>
    %10 = vector.shape_cast %9 : vector<1x4x64xf32> to vector<4x64xf32>
    %c0_9 = arith.constant 0 : index
    %c0_10 = arith.constant 0 : index
    %c0_11 = arith.constant 0 : index
    %c0_12 = arith.constant 0 : index
    %11 = vector.load %arg4[%c0_9, %c0_10, %c0_11, %c0_12] : memref<4x3x64x64xbf16, #tpu.memory_space<vmem>>, vector<1x1x64x64xbf16>
    %12 = vector.shape_cast %11 : vector<1x1x64x64xbf16> to vector<64x64xbf16>
    %cst_13 = arith.constant dense<0.000000e+00> : vector<8x64xf32>
    %13 = tpu.matmul %8, %12, %cst_13 {dimension_numbers = #tpu.dot_dimension_numbers<[1], [0], [0], [1], [0, 0, 1, 1], [], []>} : vector<8x64xbf16>, vector<64x64xbf16>, vector<8x64xf32> -> vector<8x64xf32>
    %14 = vector.extract_strided_slice %10 {offsets = [0, 0], sizes = [1, 64], strides = [1, 1]} : vector<4x64xf32> to vector<1x64xf32>
    %15 = vector.broadcast %14 : vector<1x64xf32> to vector<8x64xf32>
    %16 = arith.addf %13, %15 : vector<8x64xf32>
    %17 = arith.addf %16, %7 : vector<8x64xf32>
    %cst_14 = arith.constant 0.000000e+00 : f32
    %18 = vector.broadcast %cst_14 : f32 to vector<8x64xf32>
    %19 = arith.maximumf %17, %18 : vector<8x64xf32>
    %20 = arith.truncf %19 : vector<8x64xf32> to vector<8x64xbf16>
    %c0_15 = arith.constant 0 : index
    %c1 = arith.constant 1 : index
    %c0_16 = arith.constant 0 : index
    %c0_17 = arith.constant 0 : index
    %21 = vector.load %arg4[%c0_15, %c1, %c0_16, %c0_17] : memref<4x3x64x64xbf16, #tpu.memory_space<vmem>>, vector<1x1x64x64xbf16>
    %22 = vector.shape_cast %21 : vector<1x1x64x64xbf16> to vector<64x64xbf16>
    %cst_18 = arith.constant dense<0.000000e+00> : vector<8x64xf32>
    %23 = tpu.matmul %20, %22, %cst_18 {dimension_numbers = #tpu.dot_dimension_numbers<[1], [0], [0], [1], [0, 0, 1, 1], [], []>} : vector<8x64xbf16>, vector<64x64xbf16>, vector<8x64xf32> -> vector<8x64xf32>
    %24 = vector.extract_strided_slice %10 {offsets = [1, 0], sizes = [1, 64], strides = [1, 1]} : vector<4x64xf32> to vector<1x64xf32>
    %25 = vector.broadcast %24 : vector<1x64xf32> to vector<8x64xf32>
    %26 = arith.addf %23, %25 : vector<8x64xf32>
    %27 = arith.addf %26, %19 : vector<8x64xf32>
    %cst_19 = arith.constant 0.000000e+00 : f32
    %28 = vector.broadcast %cst_19 : f32 to vector<8x64xf32>
    %29 = arith.maximumf %27, %28 : vector<8x64xf32>
    %30 = arith.truncf %29 : vector<8x64xf32> to vector<8x64xbf16>
    %c0_20 = arith.constant 0 : index
    %c2 = arith.constant 2 : index
    %c0_21 = arith.constant 0 : index
    %c0_22 = arith.constant 0 : index
    %31 = vector.load %arg4[%c0_20, %c2, %c0_21, %c0_22] : memref<4x3x64x64xbf16, #tpu.memory_space<vmem>>, vector<1x1x64x64xbf16>
    %32 = vector.shape_cast %31 : vector<1x1x64x64xbf16> to vector<64x64xbf16>
    %cst_23 = arith.constant dense<0.000000e+00> : vector<8x64xf32>
    %33 = tpu.matmul %30, %32, %cst_23 {dimension_numbers = #tpu.dot_dimension_numbers<[1], [0], [0], [1], [0, 0, 1, 1], [], []>} : vector<8x64xbf16>, vector<64x64xbf16>, vector<8x64xf32> -> vector<8x64xf32>
    %34 = vector.extract_strided_slice %10 {offsets = [2, 0], sizes = [1, 64], strides = [1, 1]} : vector<4x64xf32> to vector<1x64xf32>
    %35 = vector.broadcast %34 : vector<1x64xf32> to vector<8x64xf32>
    %36 = arith.addf %33, %35 : vector<8x64xf32>
    %37 = arith.addf %36, %29 : vector<8x64xf32>
    %38 = vector.extract_strided_slice %10 {offsets = [3, 0], sizes = [1, 64], strides = [1, 1]} : vector<4x64xf32> to vector<1x64xf32>
    %39 = vector.broadcast %38 : vector<1x64xf32> to vector<8x64xf32>
    %40 = arith.mulf %37, %39 : vector<8x64xf32>
    %cst_24 = arith.constant 1.000000e+00 : f32
    %41 = vector.broadcast %cst_24 : f32 to vector<8x64xf32>
    %42 = arith.addf %40, %41 : vector<8x64xf32>
    %c0_25 = arith.constant 0 : index
    %c0_26 = arith.constant 0 : index
    %c0_27 = arith.constant 0 : index
    %43 = vector.load %arg6[%c0_25, %c0_26, %c0_27] : memref<4x8x64xf32, #tpu.memory_space<vmem>>, vector<1x8x64xf32>
    %44 = vector.shape_cast %43 : vector<1x8x64xf32> to vector<8x64xf32>
    %45 = vector.shape_cast %42 : vector<8x64xf32> to vector<1x8x64xf32>
    tpu.vector_store %arg6[%c0_25, %c0_26, %c0_27], %45 {strides = array<i32>} : memref<4x8x64xf32, #tpu.memory_space<vmem>>, vector<1x8x64xf32>,
    %c1_28 = arith.constant 1 : index
    %c0_29 = arith.constant 0 : index
    %c0_30 = arith.constant 0 : index
    %46 = vector.load %arg5[%c1_28, %c0_29, %c0_30] : memref<4x4x64xf32, #tpu.memory_space<vmem>>, vector<1x4x64xf32>
    %47 = vector.shape_cast %46 : vector<1x4x64xf32> to vector<4x64xf32>
    %c1_31 = arith.constant 1 : index
    %c0_32 = arith.constant 0 : index
    %c0_33 = arith.constant 0 : index
    %c0_34 = arith.constant 0 : index
    %48 = vector.load %arg4[%c1_31, %c0_32, %c0_33, %c0_34] : memref<4x3x64x64xbf16, #tpu.memory_space<vmem>>, vector<1x1x64x64xbf16>
    %49 = vector.shape_cast %48 : vector<1x1x64x64xbf16> to vector<64x64xbf16>
    %cst_35 = arith.constant dense<0.000000e+00> : vector<8x64xf32>
    %50 = tpu.matmul %8, %49, %cst_35 {dimension_numbers = #tpu.dot_dimension_numbers<[1], [0], [0], [1], [0, 0, 1, 1], [], []>} : vector<8x64xbf16>, vector<64x64xbf16>, vector<8x64xf32> -> vector<8x64xf32>
    %51 = vector.extract_strided_slice %47 {offsets = [0, 0], sizes = [1, 64], strides = [1, 1]} : vector<4x64xf32> to vector<1x64xf32>
    %52 = vector.broadcast %51 : vector<1x64xf32> to vector<8x64xf32>
    %53 = arith.addf %50, %52 : vector<8x64xf32>
    %54 = arith.addf %53, %7 : vector<8x64xf32>
    %cst_36 = arith.constant 0.000000e+00 : f32
    %55 = vector.broadcast %cst_36 : f32 to vector<8x64xf32>
    %56 = arith.maximumf %54, %55 : vector<8x64xf32>
    %57 = arith.truncf %56 : vector<8x64xf32> to vector<8x64xbf16>
    %c1_37 = arith.constant 1 : index
    %c1_38 = arith.constant 1 : index
    %c0_39 = arith.constant 0 : index
    %c0_40 = arith.constant 0 : index
    %58 = vector.load %arg4[%c1_37, %c1_38, %c0_39, %c0_40] : memref<4x3x64x64xbf16, #tpu.memory_space<vmem>>, vector<1x1x64x64xbf16>
    %59 = vector.shape_cast %58 : vector<1x1x64x64xbf16> to vector<64x64xbf16>
    %cst_41 = arith.constant dense<0.000000e+00> : vector<8x64xf32>
    %60 = tpu.matmul %57, %59, %cst_41 {dimension_numbers = #tpu.dot_dimension_numbers<[1], [0], [0], [1], [0, 0, 1, 1], [], []>} : vector<8x64xbf16>, vector<64x64xbf16>, vector<8x64xf32> -> vector<8x64xf32>
    %61 = vector.extract_strided_slice %47 {offsets = [1, 0], sizes = [1, 64], strides = [1, 1]} : vector<4x64xf32> to vector<1x64xf32>
    %62 = vector.broadcast %61 : vector<1x64xf32> to vector<8x64xf32>
    %63 = arith.addf %60, %62 : vector<8x64xf32>
    %64 = arith.addf %63, %56 : vector<8x64xf32>
    %cst_42 = arith.constant 0.000000e+00 : f32
    %65 = vector.broadcast %cst_42 : f32 to vector<8x64xf32>
    %66 = arith.maximumf %64, %65 : vector<8x64xf32>
    %67 = arith.truncf %66 : vector<8x64xf32> to vector<8x64xbf16>
    %c1_43 = arith.constant 1 : index
    %c2_44 = arith.constant 2 : index
    %c0_45 = arith.constant 0 : index
    %c0_46 = arith.constant 0 : index
    %68 = vector.load %arg4[%c1_43, %c2_44, %c0_45, %c0_46] : memref<4x3x64x64xbf16, #tpu.memory_space<vmem>>, vector<1x1x64x64xbf16>
    %69 = vector.shape_cast %68 : vector<1x1x64x64xbf16> to vector<64x64xbf16>
    %cst_47 = arith.constant dense<0.000000e+00> : vector<8x64xf32>
    %70 = tpu.matmul %67, %69, %cst_47 {dimension_numbers = #tpu.dot_dimension_numbers<[1], [0], [0], [1], [0, 0, 1, 1], [], []>} : vector<8x64xbf16>, vector<64x64xbf16>, vector<8x64xf32> -> vector<8x64xf32>
    %71 = vector.extract_strided_slice %47 {offsets = [2, 0], sizes = [1, 64], strides = [1, 1]} : vector<4x64xf32> to vector<1x64xf32>
    %72 = vector.broadcast %71 : vector<1x64xf32> to vector<8x64xf32>
    %73 = arith.addf %70, %72 : vector<8x64xf32>
    %74 = arith.addf %73, %66 : vector<8x64xf32>
    %75 = vector.extract_strided_slice %47 {offsets = [3, 0], sizes = [1, 64], strides = [1, 1]} : vector<4x64xf32> to vector<1x64xf32>
    %76 = vector.broadcast %75 : vector<1x64xf32> to vector<8x64xf32>
    %77 = arith.mulf %74, %76 : vector<8x64xf32>
    %cst_48 = arith.constant 0.000000e+00 : f32
    %78 = vector.broadcast %cst_48 : f32 to vector<8x64xf32>
    %79 = arith.addf %77, %78 : vector<8x64xf32>
    %c1_49 = arith.constant 1 : index
    %c0_50 = arith.constant 0 : index
    %c0_51 = arith.constant 0 : index
    %80 = vector.load %arg6[%c1_49, %c0_50, %c0_51] : memref<4x8x64xf32, #tpu.memory_space<vmem>>, vector<1x8x64xf32>
    %81 = vector.shape_cast %80 : vector<1x8x64xf32> to vector<8x64xf32>
    %82 = vector.shape_cast %79 : vector<8x64xf32> to vector<1x8x64xf32>
    tpu.vector_store %arg6[%c1_49, %c0_50, %c0_51], %82 {strides = array<i32>} : memref<4x8x64xf32, #tpu.memory_space<vmem>>, vector<1x8x64xf32>,
    %c2_52 = arith.constant 2 : index
    %c0_53 = arith.constant 0 : index
    %c0_54 = arith.constant 0 : index
    %83 = vector.load %arg5[%c2_52, %c0_53, %c0_54] : memref<4x4x64xf32, #tpu.memory_space<vmem>>, vector<1x4x64xf32>
    %84 = vector.shape_cast %83 : vector<1x4x64xf32> to vector<4x64xf32>
    %c2_55 = arith.constant 2 : index
    %c0_56 = arith.constant 0 : index
    %c0_57 = arith.constant 0 : index
    %c0_58 = arith.constant 0 : index
    %85 = vector.load %arg4[%c2_55, %c0_56, %c0_57, %c0_58] : memref<4x3x64x64xbf16, #tpu.memory_space<vmem>>, vector<1x1x64x64xbf16>
    %86 = vector.shape_cast %85 : vector<1x1x64x64xbf16> to vector<64x64xbf16>
    %cst_59 = arith.constant dense<0.000000e+00> : vector<8x64xf32>
    %87 = tpu.matmul %8, %86, %cst_59 {dimension_numbers = #tpu.dot_dimension_numbers<[1], [0], [0], [1], [0, 0, 1, 1], [], []>} : vector<8x64xbf16>, vector<64x64xbf16>, vector<8x64xf32> -> vector<8x64xf32>
    %88 = vector.extract_strided_slice %84 {offsets = [0, 0], sizes = [1, 64], strides = [1, 1]} : vector<4x64xf32> to vector<1x64xf32>
    %89 = vector.broadcast %88 : vector<1x64xf32> to vector<8x64xf32>
    %90 = arith.addf %87, %89 : vector<8x64xf32>
    %91 = arith.addf %90, %7 : vector<8x64xf32>
    %cst_60 = arith.constant 0.000000e+00 : f32
    %92 = vector.broadcast %cst_60 : f32 to vector<8x64xf32>
    %93 = arith.maximumf %91, %92 : vector<8x64xf32>
    %94 = arith.truncf %93 : vector<8x64xf32> to vector<8x64xbf16>
    %c2_61 = arith.constant 2 : index
    %c1_62 = arith.constant 1 : index
    %c0_63 = arith.constant 0 : index
    %c0_64 = arith.constant 0 : index
    %95 = vector.load %arg4[%c2_61, %c1_62, %c0_63, %c0_64] : memref<4x3x64x64xbf16, #tpu.memory_space<vmem>>, vector<1x1x64x64xbf16>
    %96 = vector.shape_cast %95 : vector<1x1x64x64xbf16> to vector<64x64xbf16>
    %cst_65 = arith.constant dense<0.000000e+00> : vector<8x64xf32>
    %97 = tpu.matmul %94, %96, %cst_65 {dimension_numbers = #tpu.dot_dimension_numbers<[1], [0], [0], [1], [0, 0, 1, 1], [], []>} : vector<8x64xbf16>, vector<64x64xbf16>, vector<8x64xf32> -> vector<8x64xf32>
    %98 = vector.extract_strided_slice %84 {offsets = [1, 0], sizes = [1, 64], strides = [1, 1]} : vector<4x64xf32> to vector<1x64xf32>
    %99 = vector.broadcast %98 : vector<1x64xf32> to vector<8x64xf32>
    %100 = arith.addf %97, %99 : vector<8x64xf32>
    %101 = arith.addf %100, %93 : vector<8x64xf32>
    %cst_66 = arith.constant 0.000000e+00 : f32
    %102 = vector.broadcast %cst_66 : f32 to vector<8x64xf32>
    %103 = arith.maximumf %101, %102 : vector<8x64xf32>
    %104 = arith.truncf %103 : vector<8x64xf32> to vector<8x64xbf16>
    %c2_67 = arith.constant 2 : index
    %c2_68 = arith.constant 2 : index
    %c0_69 = arith.constant 0 : index
    %c0_70 = arith.constant 0 : index
    %105 = vector.load %arg4[%c2_67, %c2_68, %c0_69, %c0_70] : memref<4x3x64x64xbf16, #tpu.memory_space<vmem>>, vector<1x1x64x64xbf16>
    %106 = vector.shape_cast %105 : vector<1x1x64x64xbf16> to vector<64x64xbf16>
    %cst_71 = arith.constant dense<0.000000e+00> : vector<8x64xf32>
    %107 = tpu.matmul %104, %106, %cst_71 {dimension_numbers = #tpu.dot_dimension_numbers<[1], [0], [0], [1], [0, 0, 1, 1], [], []>} : vector<8x64xbf16>, vector<64x64xbf16>, vector<8x64xf32> -> vector<8x64xf32>
    %108 = vector.extract_strided_slice %84 {offsets = [2, 0], sizes = [1, 64], strides = [1, 1]} : vector<4x64xf32> to vector<1x64xf32>
    %109 = vector.broadcast %108 : vector<1x64xf32> to vector<8x64xf32>
    %110 = arith.addf %107, %109 : vector<8x64xf32>
    %111 = arith.addf %110, %103 : vector<8x64xf32>
    %112 = vector.extract_strided_slice %84 {offsets = [3, 0], sizes = [1, 64], strides = [1, 1]} : vector<4x64xf32> to vector<1x64xf32>
    %113 = vector.broadcast %112 : vector<1x64xf32> to vector<8x64xf32>
    %114 = arith.mulf %111, %113 : vector<8x64xf32>
    %cst_72 = arith.constant 1.000000e+00 : f32
    %115 = vector.broadcast %cst_72 : f32 to vector<8x64xf32>
    %116 = arith.addf %114, %115 : vector<8x64xf32>
    %c2_73 = arith.constant 2 : index
    %c0_74 = arith.constant 0 : index
    %c0_75 = arith.constant 0 : index
    %117 = vector.load %arg6[%c2_73, %c0_74, %c0_75] : memref<4x8x64xf32, #tpu.memory_space<vmem>>, vector<1x8x64xf32>
    %118 = vector.shape_cast %117 : vector<1x8x64xf32> to vector<8x64xf32>
    %119 = vector.shape_cast %116 : vector<8x64xf32> to vector<1x8x64xf32>
    tpu.vector_store %arg6[%c2_73, %c0_74, %c0_75], %119 {strides = array<i32>} : memref<4x8x64xf32, #tpu.memory_space<vmem>>, vector<1x8x64xf32>,
    %c3 = arith.constant 3 : index
    %c0_76 = arith.constant 0 : index
    %c0_77 = arith.constant 0 : index
    %120 = vector.load %arg5[%c3, %c0_76, %c0_77] : memref<4x4x64xf32, #tpu.memory_space<vmem>>, vector<1x4x64xf32>
    %121 = vector.shape_cast %120 : vector<1x4x64xf32> to vector<4x64xf32>
    %c3_78 = arith.constant 3 : index
    %c0_79 = arith.constant 0 : index
    %c0_80 = arith.constant 0 : index
    %c0_81 = arith.constant 0 : index
    %122 = vector.load %arg4[%c3_78, %c0_79, %c0_80, %c0_81] : memref<4x3x64x64xbf16, #tpu.memory_space<vmem>>, vector<1x1x64x64xbf16>
    %123 = vector.shape_cast %122 : vector<1x1x64x64xbf16> to vector<64x64xbf16>
    %cst_82 = arith.constant dense<0.000000e+00> : vector<8x64xf32>
    %124 = tpu.matmul %8, %123, %cst_82 {dimension_numbers = #tpu.dot_dimension_numbers<[1], [0], [0], [1], [0, 0, 1, 1], [], []>} : vector<8x64xbf16>, vector<64x64xbf16>, vector<8x64xf32> -> vector<8x64xf32>
    %125 = vector.extract_strided_slice %121 {offsets = [0, 0], sizes = [1, 64], strides = [1, 1]} : vector<4x64xf32> to vector<1x64xf32>
    %126 = vector.broadcast %125 : vector<1x64xf32> to vector<8x64xf32>
    %127 = arith.addf %124, %126 : vector<8x64xf32>
    %128 = arith.addf %127, %7 : vector<8x64xf32>
    %cst_83 = arith.constant 0.000000e+00 : f32
    %129 = vector.broadcast %cst_83 : f32 to vector<8x64xf32>
    %130 = arith.maximumf %128, %129 : vector<8x64xf32>
    %131 = arith.truncf %130 : vector<8x64xf32> to vector<8x64xbf16>
    %c3_84 = arith.constant 3 : index
    %c1_85 = arith.constant 1 : index
    %c0_86 = arith.constant 0 : index
    %c0_87 = arith.constant 0 : index
    %132 = vector.load %arg4[%c3_84, %c1_85, %c0_86, %c0_87] : memref<4x3x64x64xbf16, #tpu.memory_space<vmem>>, vector<1x1x64x64xbf16>
    %133 = vector.shape_cast %132 : vector<1x1x64x64xbf16> to vector<64x64xbf16>
    %cst_88 = arith.constant dense<0.000000e+00> : vector<8x64xf32>
    %134 = tpu.matmul %131, %133, %cst_88 {dimension_numbers = #tpu.dot_dimension_numbers<[1], [0], [0], [1], [0, 0, 1, 1], [], []>} : vector<8x64xbf16>, vector<64x64xbf16>, vector<8x64xf32> -> vector<8x64xf32>
    %135 = vector.extract_strided_slice %121 {offsets = [1, 0], sizes = [1, 64], strides = [1, 1]} : vector<4x64xf32> to vector<1x64xf32>
    %136 = vector.broadcast %135 : vector<1x64xf32> to vector<8x64xf32>
    %137 = arith.addf %134, %136 : vector<8x64xf32>
    %138 = arith.addf %137, %130 : vector<8x64xf32>
    %cst_89 = arith.constant 0.000000e+00 : f32
    %139 = vector.broadcast %cst_89 : f32 to vector<8x64xf32>
    %140 = arith.maximumf %138, %139 : vector<8x64xf32>
    %141 = arith.truncf %140 : vector<8x64xf32> to vector<8x64xbf16>
    %c3_90 = arith.constant 3 : index
    %c2_91 = arith.constant 2 : index
    %c0_92 = arith.constant 0 : index
    %c0_93 = arith.constant 0 : index
    %142 = vector.load %arg4[%c3_90, %c2_91, %c0_92, %c0_93] : memref<4x3x64x64xbf16, #tpu.memory_space<vmem>>, vector<1x1x64x64xbf16>
    %143 = vector.shape_cast %142 : vector<1x1x64x64xbf16> to vector<64x64xbf16>
    %cst_94 = arith.constant dense<0.000000e+00> : vector<8x64xf32>
    %144 = tpu.matmul %141, %143, %cst_94 {dimension_numbers = #tpu.dot_dimension_numbers<[1], [0], [0], [1], [0, 0, 1, 1], [], []>} : vector<8x64xbf16>, vector<64x64xbf16>, vector<8x64xf32> -> vector<8x64xf32>
    %145 = vector.extract_strided_slice %121 {offsets = [2, 0], sizes = [1, 64], strides = [1, 1]} : vector<4x64xf32> to vector<1x64xf32>
    %146 = vector.broadcast %145 : vector<1x64xf32> to vector<8x64xf32>
    %147 = arith.addf %144, %146 : vector<8x64xf32>
    %148 = arith.addf %147, %140 : vector<8x64xf32>
    %149 = vector.extract_strided_slice %121 {offsets = [3, 0], sizes = [1, 64], strides = [1, 1]} : vector<4x64xf32> to vector<1x64xf32>
    %150 = vector.broadcast %149 : vector<1x64xf32> to vector<8x64xf32>
    %151 = arith.mulf %148, %150 : vector<8x64xf32>
    %cst_95 = arith.constant 0.000000e+00 : f32
    %152 = vector.broadcast %cst_95 : f32 to vector<8x64xf32>
    %153 = arith.addf %151, %152 : vector<8x64xf32>
    %c3_96 = arith.constant 3 : index
    %c0_97 = arith.constant 0 : index
    %c0_98 = arith.constant 0 : index
    %154 = vector.load %arg6[%c3_96, %c0_97, %c0_98] : memref<4x8x64xf32, #tpu.memory_space<vmem>>, vector<1x8x64xf32>
    %155 = vector.shape_cast %154 : vector<1x8x64xf32> to vector<8x64xf32>
    %156 = vector.shape_cast %153 : vector<8x64xf32> to vector<1x8x64xf32>
    tpu.vector_store %arg6[%c3_96, %c0_97, %c0_98], %156 {strides = array<i32>} : memref<4x8x64xf32, #tpu.memory_space<vmem>>, vector<1x8x64xf32>,
    return
  }
  func.func @transform_0(%arg0: i32) -> (i32, i32) {
    %c0_i32 = arith.constant 0 : i32
    %c0_i32_0 = arith.constant 0 : i32
    %c0_i32_1 = arith.constant 0 : i32
    return %c0_i32, %c0_i32_0 : i32, i32
  }
  func.func @transform_1(%arg0: i32) -> (i32, i32) {
    %c0_i32 = arith.constant 0 : i32
    %c0_i32_0 = arith.constant 0 : i32
    %c0_i32_1 = arith.constant 0 : i32
    return %c0_i32, %c0_i32_0 : i32, i32
  }
  func.func @transform_2(%arg0: i32) -> (i32, i32) {
    %c0_i32 = arith.constant 0 : i32
    %c0_i32_0 = arith.constant 0 : i32
    %c0_i32_1 = arith.constant 0 : i32
    return %c0_i32, %c0_i32_0 : i32, i32
  }
  func.func @transform_3(%arg0: i32) -> (i32, i32, i32, i32) {
    %c0_i32 = arith.constant 0 : i32
    %c0_i32_0 = arith.constant 0 : i32
    %c0_i32_1 = arith.constant 0 : i32
    %c0_i32_2 = arith.constant 0 : i32
    return %arg0, %c0_i32, %c0_i32_0, %c0_i32_1 : i32, i32, i32, i32
  }
  func.func @transform_4(%arg0: i32) -> (i32, i32, i32) {
    %c0_i32 = arith.constant 0 : i32
    %c0_i32_0 = arith.constant 0 : i32
    %c0_i32_1 = arith.constant 0 : i32
    return %arg0, %c0_i32, %c0_i32_0 : i32, i32, i32
  }
  func.func @transform_5(%arg0: i32) -> (i32, i32, i32) {
    %c0_i32 = arith.constant 0 : i32
    %c0_i32_0 = arith.constant 0 : i32
    %c0_i32_1 = arith.constant 0 : i32
    return %arg0, %c0_i32, %c0_i32_0 : i32, i32, i32
  }
}

module attributes {stable_mosaic.version = 11 : i64} {
  func.func @_film_heads_kernel(%arg0: i32, %arg1: memref<8x64xbf16, #tpu.memory_space<vmem>>, %arg2: memref<64x128xbf16, #tpu.memory_space<vmem>>, %arg3: memref<1x128xf32, #tpu.memory_space<vmem>>, %arg4: memref<8x3x128x128xbf16, #tpu.memory_space<vmem>>, %arg5: memref<8x4x128xf32, #tpu.memory_space<vmem>>, %arg6: memref<8x8x128xf32, #tpu.memory_space<vmem>>) attributes {dimension_semantics = [#tpu.dimension_semantics<parallel>], iteration_bounds = array<i64: 1>, scalar_prefetch = 0 : i64, scratch_operands = 0 : i64, tpu.core_type = #tpu.core_type<tc>, window_params = [{pipeline_mode = #tpu.pipeline_mode<synchronous>, transform_indices = @transform_0, window_bounds = array<i64: 8, 64>}, {pipeline_mode = #tpu.pipeline_mode<synchronous>, transform_indices = @transform_1, window_bounds = array<i64: 64, 128>}, {pipeline_mode = #tpu.pipeline_mode<synchronous>, transform_indices = @transform_2, window_bounds = array<i64: 1, 128>}, {transform_indices = @transform_3, window_bounds = array<i64: 8, 3, 128, 128>}, {transform_indices = @transform_4, window_bounds = array<i64: 8, 4, 128>}, {transform_indices = @transform_5, window_bounds = array<i64: 8, 8, 128>}]} {
    %c0 = arith.constant 0 : index
    %c0_0 = arith.constant 0 : index
    %0 = vector.load %arg1[%c0, %c0_0] : memref<8x64xbf16, #tpu.memory_space<vmem>>, vector<8x64xbf16>
    %c0_1 = arith.constant 0 : index
    %c0_2 = arith.constant 0 : index
    %1 = vector.load %arg2[%c0_1, %c0_2] : memref<64x128xbf16, #tpu.memory_space<vmem>>, vector<64x128xbf16>
    %cst = arith.constant dense<0.000000e+00> : vector<8x128xf32>
    %2 = tpu.matmul %0, %1, %cst {dimension_numbers = #tpu.dot_dimension_numbers<[1], [0], [0], [1], [0, 0, 1, 1], [], []>} : vector<8x64xbf16>, vector<64x128xbf16>, vector<8x128xf32> -> vector<8x128xf32>
    %c0_3 = arith.constant 0 : index
    %c0_4 = arith.constant 0 : index
    %3 = vector.load %arg3[%c0_3, %c0_4] : memref<1x128xf32, #tpu.memory_space<vmem>>, vector<1x128xf32>
    %4 = vector.broadcast %3 : vector<1x128xf32> to vector<8x128xf32>
    %5 = arith.addf %2, %4 : vector<8x128xf32>
    %cst_5 = arith.constant 0.000000e+00 : f32
    %6 = vector.broadcast %cst_5 : f32 to vector<8x128xf32>
    %7 = arith.maximumf %5, %6 : vector<8x128xf32>
    %8 = arith.truncf %7 : vector<8x128xf32> to vector<8x128xbf16>
    %c0_6 = arith.constant 0 : index
    %c0_7 = arith.constant 0 : index
    %c0_8 = arith.constant 0 : index
    %9 = vector.load %arg5[%c0_6, %c0_7, %c0_8] : memref<8x4x128xf32, #tpu.memory_space<vmem>>, vector<1x4x128xf32>
    %10 = vector.shape_cast %9 : vector<1x4x128xf32> to vector<4x128xf32>
    %c0_9 = arith.constant 0 : index
    %c0_10 = arith.constant 0 : index
    %c0_11 = arith.constant 0 : index
    %c0_12 = arith.constant 0 : index
    %11 = vector.load %arg4[%c0_9, %c0_10, %c0_11, %c0_12] : memref<8x3x128x128xbf16, #tpu.memory_space<vmem>>, vector<1x1x128x128xbf16>
    %12 = vector.shape_cast %11 : vector<1x1x128x128xbf16> to vector<128x128xbf16>
    %cst_13 = arith.constant dense<0.000000e+00> : vector<8x128xf32>
    %13 = tpu.matmul %8, %12, %cst_13 {dimension_numbers = #tpu.dot_dimension_numbers<[1], [0], [0], [1], [0, 0, 1, 1], [], []>} : vector<8x128xbf16>, vector<128x128xbf16>, vector<8x128xf32> -> vector<8x128xf32>
    %14 = vector.extract_strided_slice %10 {offsets = [0, 0], sizes = [1, 128], strides = [1, 1]} : vector<4x128xf32> to vector<1x128xf32>
    %15 = vector.broadcast %14 : vector<1x128xf32> to vector<8x128xf32>
    %16 = arith.addf %13, %15 : vector<8x128xf32>
    %17 = arith.addf %16, %7 : vector<8x128xf32>
    %cst_14 = arith.constant 0.000000e+00 : f32
    %18 = vector.broadcast %cst_14 : f32 to vector<8x128xf32>
    %19 = arith.maximumf %17, %18 : vector<8x128xf32>
    %20 = arith.truncf %19 : vector<8x128xf32> to vector<8x128xbf16>
    %c0_15 = arith.constant 0 : index
    %c1 = arith.constant 1 : index
    %c0_16 = arith.constant 0 : index
    %c0_17 = arith.constant 0 : index
    %21 = vector.load %arg4[%c0_15, %c1, %c0_16, %c0_17] : memref<8x3x128x128xbf16, #tpu.memory_space<vmem>>, vector<1x1x128x128xbf16>
    %22 = vector.shape_cast %21 : vector<1x1x128x128xbf16> to vector<128x128xbf16>
    %cst_18 = arith.constant dense<0.000000e+00> : vector<8x128xf32>
    %23 = tpu.matmul %20, %22, %cst_18 {dimension_numbers = #tpu.dot_dimension_numbers<[1], [0], [0], [1], [0, 0, 1, 1], [], []>} : vector<8x128xbf16>, vector<128x128xbf16>, vector<8x128xf32> -> vector<8x128xf32>
    %24 = vector.extract_strided_slice %10 {offsets = [1, 0], sizes = [1, 128], strides = [1, 1]} : vector<4x128xf32> to vector<1x128xf32>
    %25 = vector.broadcast %24 : vector<1x128xf32> to vector<8x128xf32>
    %26 = arith.addf %23, %25 : vector<8x128xf32>
    %27 = arith.addf %26, %19 : vector<8x128xf32>
    %cst_19 = arith.constant 0.000000e+00 : f32
    %28 = vector.broadcast %cst_19 : f32 to vector<8x128xf32>
    %29 = arith.maximumf %27, %28 : vector<8x128xf32>
    %30 = arith.truncf %29 : vector<8x128xf32> to vector<8x128xbf16>
    %c0_20 = arith.constant 0 : index
    %c2 = arith.constant 2 : index
    %c0_21 = arith.constant 0 : index
    %c0_22 = arith.constant 0 : index
    %31 = vector.load %arg4[%c0_20, %c2, %c0_21, %c0_22] : memref<8x3x128x128xbf16, #tpu.memory_space<vmem>>, vector<1x1x128x128xbf16>
    %32 = vector.shape_cast %31 : vector<1x1x128x128xbf16> to vector<128x128xbf16>
    %cst_23 = arith.constant dense<0.000000e+00> : vector<8x128xf32>
    %33 = tpu.matmul %30, %32, %cst_23 {dimension_numbers = #tpu.dot_dimension_numbers<[1], [0], [0], [1], [0, 0, 1, 1], [], []>} : vector<8x128xbf16>, vector<128x128xbf16>, vector<8x128xf32> -> vector<8x128xf32>
    %34 = vector.extract_strided_slice %10 {offsets = [2, 0], sizes = [1, 128], strides = [1, 1]} : vector<4x128xf32> to vector<1x128xf32>
    %35 = vector.broadcast %34 : vector<1x128xf32> to vector<8x128xf32>
    %36 = arith.addf %33, %35 : vector<8x128xf32>
    %37 = arith.addf %36, %29 : vector<8x128xf32>
    %38 = vector.extract_strided_slice %10 {offsets = [3, 0], sizes = [1, 128], strides = [1, 1]} : vector<4x128xf32> to vector<1x128xf32>
    %39 = vector.broadcast %38 : vector<1x128xf32> to vector<8x128xf32>
    %40 = arith.mulf %37, %39 : vector<8x128xf32>
    %cst_24 = arith.constant 1.000000e+00 : f32
    %41 = vector.broadcast %cst_24 : f32 to vector<8x128xf32>
    %42 = arith.addf %40, %41 : vector<8x128xf32>
    %c0_25 = arith.constant 0 : index
    %c0_26 = arith.constant 0 : index
    %c0_27 = arith.constant 0 : index
    %43 = vector.load %arg6[%c0_25, %c0_26, %c0_27] : memref<8x8x128xf32, #tpu.memory_space<vmem>>, vector<1x8x128xf32>
    %44 = vector.shape_cast %43 : vector<1x8x128xf32> to vector<8x128xf32>
    %45 = vector.shape_cast %42 : vector<8x128xf32> to vector<1x8x128xf32>
    tpu.vector_store %arg6[%c0_25, %c0_26, %c0_27], %45 {strides = array<i32>} : memref<8x8x128xf32, #tpu.memory_space<vmem>>, vector<1x8x128xf32>,
    %c1_28 = arith.constant 1 : index
    %c0_29 = arith.constant 0 : index
    %c0_30 = arith.constant 0 : index
    %46 = vector.load %arg5[%c1_28, %c0_29, %c0_30] : memref<8x4x128xf32, #tpu.memory_space<vmem>>, vector<1x4x128xf32>
    %47 = vector.shape_cast %46 : vector<1x4x128xf32> to vector<4x128xf32>
    %c1_31 = arith.constant 1 : index
    %c0_32 = arith.constant 0 : index
    %c0_33 = arith.constant 0 : index
    %c0_34 = arith.constant 0 : index
    %48 = vector.load %arg4[%c1_31, %c0_32, %c0_33, %c0_34] : memref<8x3x128x128xbf16, #tpu.memory_space<vmem>>, vector<1x1x128x128xbf16>
    %49 = vector.shape_cast %48 : vector<1x1x128x128xbf16> to vector<128x128xbf16>
    %cst_35 = arith.constant dense<0.000000e+00> : vector<8x128xf32>
    %50 = tpu.matmul %8, %49, %cst_35 {dimension_numbers = #tpu.dot_dimension_numbers<[1], [0], [0], [1], [0, 0, 1, 1], [], []>} : vector<8x128xbf16>, vector<128x128xbf16>, vector<8x128xf32> -> vector<8x128xf32>
    %51 = vector.extract_strided_slice %47 {offsets = [0, 0], sizes = [1, 128], strides = [1, 1]} : vector<4x128xf32> to vector<1x128xf32>
    %52 = vector.broadcast %51 : vector<1x128xf32> to vector<8x128xf32>
    %53 = arith.addf %50, %52 : vector<8x128xf32>
    %54 = arith.addf %53, %7 : vector<8x128xf32>
    %cst_36 = arith.constant 0.000000e+00 : f32
    %55 = vector.broadcast %cst_36 : f32 to vector<8x128xf32>
    %56 = arith.maximumf %54, %55 : vector<8x128xf32>
    %57 = arith.truncf %56 : vector<8x128xf32> to vector<8x128xbf16>
    %c1_37 = arith.constant 1 : index
    %c1_38 = arith.constant 1 : index
    %c0_39 = arith.constant 0 : index
    %c0_40 = arith.constant 0 : index
    %58 = vector.load %arg4[%c1_37, %c1_38, %c0_39, %c0_40] : memref<8x3x128x128xbf16, #tpu.memory_space<vmem>>, vector<1x1x128x128xbf16>
    %59 = vector.shape_cast %58 : vector<1x1x128x128xbf16> to vector<128x128xbf16>
    %cst_41 = arith.constant dense<0.000000e+00> : vector<8x128xf32>
    %60 = tpu.matmul %57, %59, %cst_41 {dimension_numbers = #tpu.dot_dimension_numbers<[1], [0], [0], [1], [0, 0, 1, 1], [], []>} : vector<8x128xbf16>, vector<128x128xbf16>, vector<8x128xf32> -> vector<8x128xf32>
    %61 = vector.extract_strided_slice %47 {offsets = [1, 0], sizes = [1, 128], strides = [1, 1]} : vector<4x128xf32> to vector<1x128xf32>
    %62 = vector.broadcast %61 : vector<1x128xf32> to vector<8x128xf32>
    %63 = arith.addf %60, %62 : vector<8x128xf32>
    %64 = arith.addf %63, %56 : vector<8x128xf32>
    %cst_42 = arith.constant 0.000000e+00 : f32
    %65 = vector.broadcast %cst_42 : f32 to vector<8x128xf32>
    %66 = arith.maximumf %64, %65 : vector<8x128xf32>
    %67 = arith.truncf %66 : vector<8x128xf32> to vector<8x128xbf16>
    %c1_43 = arith.constant 1 : index
    %c2_44 = arith.constant 2 : index
    %c0_45 = arith.constant 0 : index
    %c0_46 = arith.constant 0 : index
    %68 = vector.load %arg4[%c1_43, %c2_44, %c0_45, %c0_46] : memref<8x3x128x128xbf16, #tpu.memory_space<vmem>>, vector<1x1x128x128xbf16>
    %69 = vector.shape_cast %68 : vector<1x1x128x128xbf16> to vector<128x128xbf16>
    %cst_47 = arith.constant dense<0.000000e+00> : vector<8x128xf32>
    %70 = tpu.matmul %67, %69, %cst_47 {dimension_numbers = #tpu.dot_dimension_numbers<[1], [0], [0], [1], [0, 0, 1, 1], [], []>} : vector<8x128xbf16>, vector<128x128xbf16>, vector<8x128xf32> -> vector<8x128xf32>
    %71 = vector.extract_strided_slice %47 {offsets = [2, 0], sizes = [1, 128], strides = [1, 1]} : vector<4x128xf32> to vector<1x128xf32>
    %72 = vector.broadcast %71 : vector<1x128xf32> to vector<8x128xf32>
    %73 = arith.addf %70, %72 : vector<8x128xf32>
    %74 = arith.addf %73, %66 : vector<8x128xf32>
    %75 = vector.extract_strided_slice %47 {offsets = [3, 0], sizes = [1, 128], strides = [1, 1]} : vector<4x128xf32> to vector<1x128xf32>
    %76 = vector.broadcast %75 : vector<1x128xf32> to vector<8x128xf32>
    %77 = arith.mulf %74, %76 : vector<8x128xf32>
    %cst_48 = arith.constant 0.000000e+00 : f32
    %78 = vector.broadcast %cst_48 : f32 to vector<8x128xf32>
    %79 = arith.addf %77, %78 : vector<8x128xf32>
    %c1_49 = arith.constant 1 : index
    %c0_50 = arith.constant 0 : index
    %c0_51 = arith.constant 0 : index
    %80 = vector.load %arg6[%c1_49, %c0_50, %c0_51] : memref<8x8x128xf32, #tpu.memory_space<vmem>>, vector<1x8x128xf32>
    %81 = vector.shape_cast %80 : vector<1x8x128xf32> to vector<8x128xf32>
    %82 = vector.shape_cast %79 : vector<8x128xf32> to vector<1x8x128xf32>
    tpu.vector_store %arg6[%c1_49, %c0_50, %c0_51], %82 {strides = array<i32>} : memref<8x8x128xf32, #tpu.memory_space<vmem>>, vector<1x8x128xf32>,
    %c2_52 = arith.constant 2 : index
    %c0_53 = arith.constant 0 : index
    %c0_54 = arith.constant 0 : index
    %83 = vector.load %arg5[%c2_52, %c0_53, %c0_54] : memref<8x4x128xf32, #tpu.memory_space<vmem>>, vector<1x4x128xf32>
    %84 = vector.shape_cast %83 : vector<1x4x128xf32> to vector<4x128xf32>
    %c2_55 = arith.constant 2 : index
    %c0_56 = arith.constant 0 : index
    %c0_57 = arith.constant 0 : index
    %c0_58 = arith.constant 0 : index
    %85 = vector.load %arg4[%c2_55, %c0_56, %c0_57, %c0_58] : memref<8x3x128x128xbf16, #tpu.memory_space<vmem>>, vector<1x1x128x128xbf16>
    %86 = vector.shape_cast %85 : vector<1x1x128x128xbf16> to vector<128x128xbf16>
    %cst_59 = arith.constant dense<0.000000e+00> : vector<8x128xf32>
    %87 = tpu.matmul %8, %86, %cst_59 {dimension_numbers = #tpu.dot_dimension_numbers<[1], [0], [0], [1], [0, 0, 1, 1], [], []>} : vector<8x128xbf16>, vector<128x128xbf16>, vector<8x128xf32> -> vector<8x128xf32>
    %88 = vector.extract_strided_slice %84 {offsets = [0, 0], sizes = [1, 128], strides = [1, 1]} : vector<4x128xf32> to vector<1x128xf32>
    %89 = vector.broadcast %88 : vector<1x128xf32> to vector<8x128xf32>
    %90 = arith.addf %87, %89 : vector<8x128xf32>
    %91 = arith.addf %90, %7 : vector<8x128xf32>
    %cst_60 = arith.constant 0.000000e+00 : f32
    %92 = vector.broadcast %cst_60 : f32 to vector<8x128xf32>
    %93 = arith.maximumf %91, %92 : vector<8x128xf32>
    %94 = arith.truncf %93 : vector<8x128xf32> to vector<8x128xbf16>
    %c2_61 = arith.constant 2 : index
    %c1_62 = arith.constant 1 : index
    %c0_63 = arith.constant 0 : index
    %c0_64 = arith.constant 0 : index
    %95 = vector.load %arg4[%c2_61, %c1_62, %c0_63, %c0_64] : memref<8x3x128x128xbf16, #tpu.memory_space<vmem>>, vector<1x1x128x128xbf16>
    %96 = vector.shape_cast %95 : vector<1x1x128x128xbf16> to vector<128x128xbf16>
    %cst_65 = arith.constant dense<0.000000e+00> : vector<8x128xf32>
    %97 = tpu.matmul %94, %96, %cst_65 {dimension_numbers = #tpu.dot_dimension_numbers<[1], [0], [0], [1], [0, 0, 1, 1], [], []>} : vector<8x128xbf16>, vector<128x128xbf16>, vector<8x128xf32> -> vector<8x128xf32>
    %98 = vector.extract_strided_slice %84 {offsets = [1, 0], sizes = [1, 128], strides = [1, 1]} : vector<4x128xf32> to vector<1x128xf32>
    %99 = vector.broadcast %98 : vector<1x128xf32> to vector<8x128xf32>
    %100 = arith.addf %97, %99 : vector<8x128xf32>
    %101 = arith.addf %100, %93 : vector<8x128xf32>
    %cst_66 = arith.constant 0.000000e+00 : f32
    %102 = vector.broadcast %cst_66 : f32 to vector<8x128xf32>
    %103 = arith.maximumf %101, %102 : vector<8x128xf32>
    %104 = arith.truncf %103 : vector<8x128xf32> to vector<8x128xbf16>
    %c2_67 = arith.constant 2 : index
    %c2_68 = arith.constant 2 : index
    %c0_69 = arith.constant 0 : index
    %c0_70 = arith.constant 0 : index
    %105 = vector.load %arg4[%c2_67, %c2_68, %c0_69, %c0_70] : memref<8x3x128x128xbf16, #tpu.memory_space<vmem>>, vector<1x1x128x128xbf16>
    %106 = vector.shape_cast %105 : vector<1x1x128x128xbf16> to vector<128x128xbf16>
    %cst_71 = arith.constant dense<0.000000e+00> : vector<8x128xf32>
    %107 = tpu.matmul %104, %106, %cst_71 {dimension_numbers = #tpu.dot_dimension_numbers<[1], [0], [0], [1], [0, 0, 1, 1], [], []>} : vector<8x128xbf16>, vector<128x128xbf16>, vector<8x128xf32> -> vector<8x128xf32>
    %108 = vector.extract_strided_slice %84 {offsets = [2, 0], sizes = [1, 128], strides = [1, 1]} : vector<4x128xf32> to vector<1x128xf32>
    %109 = vector.broadcast %108 : vector<1x128xf32> to vector<8x128xf32>
    %110 = arith.addf %107, %109 : vector<8x128xf32>
    %111 = arith.addf %110, %103 : vector<8x128xf32>
    %112 = vector.extract_strided_slice %84 {offsets = [3, 0], sizes = [1, 128], strides = [1, 1]} : vector<4x128xf32> to vector<1x128xf32>
    %113 = vector.broadcast %112 : vector<1x128xf32> to vector<8x128xf32>
    %114 = arith.mulf %111, %113 : vector<8x128xf32>
    %cst_72 = arith.constant 1.000000e+00 : f32
    %115 = vector.broadcast %cst_72 : f32 to vector<8x128xf32>
    %116 = arith.addf %114, %115 : vector<8x128xf32>
    %c2_73 = arith.constant 2 : index
    %c0_74 = arith.constant 0 : index
    %c0_75 = arith.constant 0 : index
    %117 = vector.load %arg6[%c2_73, %c0_74, %c0_75] : memref<8x8x128xf32, #tpu.memory_space<vmem>>, vector<1x8x128xf32>
    %118 = vector.shape_cast %117 : vector<1x8x128xf32> to vector<8x128xf32>
    %119 = vector.shape_cast %116 : vector<8x128xf32> to vector<1x8x128xf32>
    tpu.vector_store %arg6[%c2_73, %c0_74, %c0_75], %119 {strides = array<i32>} : memref<8x8x128xf32, #tpu.memory_space<vmem>>, vector<1x8x128xf32>,
    %c3 = arith.constant 3 : index
    %c0_76 = arith.constant 0 : index
    %c0_77 = arith.constant 0 : index
    %120 = vector.load %arg5[%c3, %c0_76, %c0_77] : memref<8x4x128xf32, #tpu.memory_space<vmem>>, vector<1x4x128xf32>
    %121 = vector.shape_cast %120 : vector<1x4x128xf32> to vector<4x128xf32>
    %c3_78 = arith.constant 3 : index
    %c0_79 = arith.constant 0 : index
    %c0_80 = arith.constant 0 : index
    %c0_81 = arith.constant 0 : index
    %122 = vector.load %arg4[%c3_78, %c0_79, %c0_80, %c0_81] : memref<8x3x128x128xbf16, #tpu.memory_space<vmem>>, vector<1x1x128x128xbf16>
    %123 = vector.shape_cast %122 : vector<1x1x128x128xbf16> to vector<128x128xbf16>
    %cst_82 = arith.constant dense<0.000000e+00> : vector<8x128xf32>
    %124 = tpu.matmul %8, %123, %cst_82 {dimension_numbers = #tpu.dot_dimension_numbers<[1], [0], [0], [1], [0, 0, 1, 1], [], []>} : vector<8x128xbf16>, vector<128x128xbf16>, vector<8x128xf32> -> vector<8x128xf32>
    %125 = vector.extract_strided_slice %121 {offsets = [0, 0], sizes = [1, 128], strides = [1, 1]} : vector<4x128xf32> to vector<1x128xf32>
    %126 = vector.broadcast %125 : vector<1x128xf32> to vector<8x128xf32>
    %127 = arith.addf %124, %126 : vector<8x128xf32>
    %128 = arith.addf %127, %7 : vector<8x128xf32>
    %cst_83 = arith.constant 0.000000e+00 : f32
    %129 = vector.broadcast %cst_83 : f32 to vector<8x128xf32>
    %130 = arith.maximumf %128, %129 : vector<8x128xf32>
    %131 = arith.truncf %130 : vector<8x128xf32> to vector<8x128xbf16>
    %c3_84 = arith.constant 3 : index
    %c1_85 = arith.constant 1 : index
    %c0_86 = arith.constant 0 : index
    %c0_87 = arith.constant 0 : index
    %132 = vector.load %arg4[%c3_84, %c1_85, %c0_86, %c0_87] : memref<8x3x128x128xbf16, #tpu.memory_space<vmem>>, vector<1x1x128x128xbf16>
    %133 = vector.shape_cast %132 : vector<1x1x128x128xbf16> to vector<128x128xbf16>
    %cst_88 = arith.constant dense<0.000000e+00> : vector<8x128xf32>
    %134 = tpu.matmul %131, %133, %cst_88 {dimension_numbers = #tpu.dot_dimension_numbers<[1], [0], [0], [1], [0, 0, 1, 1], [], []>} : vector<8x128xbf16>, vector<128x128xbf16>, vector<8x128xf32> -> vector<8x128xf32>
    %135 = vector.extract_strided_slice %121 {offsets = [1, 0], sizes = [1, 128], strides = [1, 1]} : vector<4x128xf32> to vector<1x128xf32>
    %136 = vector.broadcast %135 : vector<1x128xf32> to vector<8x128xf32>
    %137 = arith.addf %134, %136 : vector<8x128xf32>
    %138 = arith.addf %137, %130 : vector<8x128xf32>
    %cst_89 = arith.constant 0.000000e+00 : f32
    %139 = vector.broadcast %cst_89 : f32 to vector<8x128xf32>
    %140 = arith.maximumf %138, %139 : vector<8x128xf32>
    %141 = arith.truncf %140 : vector<8x128xf32> to vector<8x128xbf16>
    %c3_90 = arith.constant 3 : index
    %c2_91 = arith.constant 2 : index
    %c0_92 = arith.constant 0 : index
    %c0_93 = arith.constant 0 : index
    %142 = vector.load %arg4[%c3_90, %c2_91, %c0_92, %c0_93] : memref<8x3x128x128xbf16, #tpu.memory_space<vmem>>, vector<1x1x128x128xbf16>
    %143 = vector.shape_cast %142 : vector<1x1x128x128xbf16> to vector<128x128xbf16>
    %cst_94 = arith.constant dense<0.000000e+00> : vector<8x128xf32>
    %144 = tpu.matmul %141, %143, %cst_94 {dimension_numbers = #tpu.dot_dimension_numbers<[1], [0], [0], [1], [0, 0, 1, 1], [], []>} : vector<8x128xbf16>, vector<128x128xbf16>, vector<8x128xf32> -> vector<8x128xf32>
    %145 = vector.extract_strided_slice %121 {offsets = [2, 0], sizes = [1, 128], strides = [1, 1]} : vector<4x128xf32> to vector<1x128xf32>
    %146 = vector.broadcast %145 : vector<1x128xf32> to vector<8x128xf32>
    %147 = arith.addf %144, %146 : vector<8x128xf32>
    %148 = arith.addf %147, %140 : vector<8x128xf32>
    %149 = vector.extract_strided_slice %121 {offsets = [3, 0], sizes = [1, 128], strides = [1, 1]} : vector<4x128xf32> to vector<1x128xf32>
    %150 = vector.broadcast %149 : vector<1x128xf32> to vector<8x128xf32>
    %151 = arith.mulf %148, %150 : vector<8x128xf32>
    %cst_95 = arith.constant 0.000000e+00 : f32
    %152 = vector.broadcast %cst_95 : f32 to vector<8x128xf32>
    %153 = arith.addf %151, %152 : vector<8x128xf32>
    %c3_96 = arith.constant 3 : index
    %c0_97 = arith.constant 0 : index
    %c0_98 = arith.constant 0 : index
    %154 = vector.load %arg6[%c3_96, %c0_97, %c0_98] : memref<8x8x128xf32, #tpu.memory_space<vmem>>, vector<1x8x128xf32>
    %155 = vector.shape_cast %154 : vector<1x8x128xf32> to vector<8x128xf32>
    %156 = vector.shape_cast %153 : vector<8x128xf32> to vector<1x8x128xf32>
    tpu.vector_store %arg6[%c3_96, %c0_97, %c0_98], %156 {strides = array<i32>} : memref<8x8x128xf32, #tpu.memory_space<vmem>>, vector<1x8x128xf32>,
    %c4 = arith.constant 4 : index
    %c0_99 = arith.constant 0 : index
    %c0_100 = arith.constant 0 : index
    %157 = vector.load %arg5[%c4, %c0_99, %c0_100] : memref<8x4x128xf32, #tpu.memory_space<vmem>>, vector<1x4x128xf32>
    %158 = vector.shape_cast %157 : vector<1x4x128xf32> to vector<4x128xf32>
    %c4_101 = arith.constant 4 : index
    %c0_102 = arith.constant 0 : index
    %c0_103 = arith.constant 0 : index
    %c0_104 = arith.constant 0 : index
    %159 = vector.load %arg4[%c4_101, %c0_102, %c0_103, %c0_104] : memref<8x3x128x128xbf16, #tpu.memory_space<vmem>>, vector<1x1x128x128xbf16>
    %160 = vector.shape_cast %159 : vector<1x1x128x128xbf16> to vector<128x128xbf16>
    %cst_105 = arith.constant dense<0.000000e+00> : vector<8x128xf32>
    %161 = tpu.matmul %8, %160, %cst_105 {dimension_numbers = #tpu.dot_dimension_numbers<[1], [0], [0], [1], [0, 0, 1, 1], [], []>} : vector<8x128xbf16>, vector<128x128xbf16>, vector<8x128xf32> -> vector<8x128xf32>
    %162 = vector.extract_strided_slice %158 {offsets = [0, 0], sizes = [1, 128], strides = [1, 1]} : vector<4x128xf32> to vector<1x128xf32>
    %163 = vector.broadcast %162 : vector<1x128xf32> to vector<8x128xf32>
    %164 = arith.addf %161, %163 : vector<8x128xf32>
    %165 = arith.addf %164, %7 : vector<8x128xf32>
    %cst_106 = arith.constant 0.000000e+00 : f32
    %166 = vector.broadcast %cst_106 : f32 to vector<8x128xf32>
    %167 = arith.maximumf %165, %166 : vector<8x128xf32>
    %168 = arith.truncf %167 : vector<8x128xf32> to vector<8x128xbf16>
    %c4_107 = arith.constant 4 : index
    %c1_108 = arith.constant 1 : index
    %c0_109 = arith.constant 0 : index
    %c0_110 = arith.constant 0 : index
    %169 = vector.load %arg4[%c4_107, %c1_108, %c0_109, %c0_110] : memref<8x3x128x128xbf16, #tpu.memory_space<vmem>>, vector<1x1x128x128xbf16>
    %170 = vector.shape_cast %169 : vector<1x1x128x128xbf16> to vector<128x128xbf16>
    %cst_111 = arith.constant dense<0.000000e+00> : vector<8x128xf32>
    %171 = tpu.matmul %168, %170, %cst_111 {dimension_numbers = #tpu.dot_dimension_numbers<[1], [0], [0], [1], [0, 0, 1, 1], [], []>} : vector<8x128xbf16>, vector<128x128xbf16>, vector<8x128xf32> -> vector<8x128xf32>
    %172 = vector.extract_strided_slice %158 {offsets = [1, 0], sizes = [1, 128], strides = [1, 1]} : vector<4x128xf32> to vector<1x128xf32>
    %173 = vector.broadcast %172 : vector<1x128xf32> to vector<8x128xf32>
    %174 = arith.addf %171, %173 : vector<8x128xf32>
    %175 = arith.addf %174, %167 : vector<8x128xf32>
    %cst_112 = arith.constant 0.000000e+00 : f32
    %176 = vector.broadcast %cst_112 : f32 to vector<8x128xf32>
    %177 = arith.maximumf %175, %176 : vector<8x128xf32>
    %178 = arith.truncf %177 : vector<8x128xf32> to vector<8x128xbf16>
    %c4_113 = arith.constant 4 : index
    %c2_114 = arith.constant 2 : index
    %c0_115 = arith.constant 0 : index
    %c0_116 = arith.constant 0 : index
    %179 = vector.load %arg4[%c4_113, %c2_114, %c0_115, %c0_116] : memref<8x3x128x128xbf16, #tpu.memory_space<vmem>>, vector<1x1x128x128xbf16>
    %180 = vector.shape_cast %179 : vector<1x1x128x128xbf16> to vector<128x128xbf16>
    %cst_117 = arith.constant dense<0.000000e+00> : vector<8x128xf32>
    %181 = tpu.matmul %178, %180, %cst_117 {dimension_numbers = #tpu.dot_dimension_numbers<[1], [0], [0], [1], [0, 0, 1, 1], [], []>} : vector<8x128xbf16>, vector<128x128xbf16>, vector<8x128xf32> -> vector<8x128xf32>
    %182 = vector.extract_strided_slice %158 {offsets = [2, 0], sizes = [1, 128], strides = [1, 1]} : vector<4x128xf32> to vector<1x128xf32>
    %183 = vector.broadcast %182 : vector<1x128xf32> to vector<8x128xf32>
    %184 = arith.addf %181, %183 : vector<8x128xf32>
    %185 = arith.addf %184, %177 : vector<8x128xf32>
    %186 = vector.extract_strided_slice %158 {offsets = [3, 0], sizes = [1, 128], strides = [1, 1]} : vector<4x128xf32> to vector<1x128xf32>
    %187 = vector.broadcast %186 : vector<1x128xf32> to vector<8x128xf32>
    %188 = arith.mulf %185, %187 : vector<8x128xf32>
    %cst_118 = arith.constant 1.000000e+00 : f32
    %189 = vector.broadcast %cst_118 : f32 to vector<8x128xf32>
    %190 = arith.addf %188, %189 : vector<8x128xf32>
    %c4_119 = arith.constant 4 : index
    %c0_120 = arith.constant 0 : index
    %c0_121 = arith.constant 0 : index
    %191 = vector.load %arg6[%c4_119, %c0_120, %c0_121] : memref<8x8x128xf32, #tpu.memory_space<vmem>>, vector<1x8x128xf32>
    %192 = vector.shape_cast %191 : vector<1x8x128xf32> to vector<8x128xf32>
    %193 = vector.shape_cast %190 : vector<8x128xf32> to vector<1x8x128xf32>
    tpu.vector_store %arg6[%c4_119, %c0_120, %c0_121], %193 {strides = array<i32>} : memref<8x8x128xf32, #tpu.memory_space<vmem>>, vector<1x8x128xf32>,
    %c5 = arith.constant 5 : index
    %c0_122 = arith.constant 0 : index
    %c0_123 = arith.constant 0 : index
    %194 = vector.load %arg5[%c5, %c0_122, %c0_123] : memref<8x4x128xf32, #tpu.memory_space<vmem>>, vector<1x4x128xf32>
    %195 = vector.shape_cast %194 : vector<1x4x128xf32> to vector<4x128xf32>
    %c5_124 = arith.constant 5 : index
    %c0_125 = arith.constant 0 : index
    %c0_126 = arith.constant 0 : index
    %c0_127 = arith.constant 0 : index
    %196 = vector.load %arg4[%c5_124, %c0_125, %c0_126, %c0_127] : memref<8x3x128x128xbf16, #tpu.memory_space<vmem>>, vector<1x1x128x128xbf16>
    %197 = vector.shape_cast %196 : vector<1x1x128x128xbf16> to vector<128x128xbf16>
    %cst_128 = arith.constant dense<0.000000e+00> : vector<8x128xf32>
    %198 = tpu.matmul %8, %197, %cst_128 {dimension_numbers = #tpu.dot_dimension_numbers<[1], [0], [0], [1], [0, 0, 1, 1], [], []>} : vector<8x128xbf16>, vector<128x128xbf16>, vector<8x128xf32> -> vector<8x128xf32>
    %199 = vector.extract_strided_slice %195 {offsets = [0, 0], sizes = [1, 128], strides = [1, 1]} : vector<4x128xf32> to vector<1x128xf32>
    %200 = vector.broadcast %199 : vector<1x128xf32> to vector<8x128xf32>
    %201 = arith.addf %198, %200 : vector<8x128xf32>
    %202 = arith.addf %201, %7 : vector<8x128xf32>
    %cst_129 = arith.constant 0.000000e+00 : f32
    %203 = vector.broadcast %cst_129 : f32 to vector<8x128xf32>
    %204 = arith.maximumf %202, %203 : vector<8x128xf32>
    %205 = arith.truncf %204 : vector<8x128xf32> to vector<8x128xbf16>
    %c5_130 = arith.constant 5 : index
    %c1_131 = arith.constant 1 : index
    %c0_132 = arith.constant 0 : index
    %c0_133 = arith.constant 0 : index
    %206 = vector.load %arg4[%c5_130, %c1_131, %c0_132, %c0_133] : memref<8x3x128x128xbf16, #tpu.memory_space<vmem>>, vector<1x1x128x128xbf16>
    %207 = vector.shape_cast %206 : vector<1x1x128x128xbf16> to vector<128x128xbf16>
    %cst_134 = arith.constant dense<0.000000e+00> : vector<8x128xf32>
    %208 = tpu.matmul %205, %207, %cst_134 {dimension_numbers = #tpu.dot_dimension_numbers<[1], [0], [0], [1], [0, 0, 1, 1], [], []>} : vector<8x128xbf16>, vector<128x128xbf16>, vector<8x128xf32> -> vector<8x128xf32>
    %209 = vector.extract_strided_slice %195 {offsets = [1, 0], sizes = [1, 128], strides = [1, 1]} : vector<4x128xf32> to vector<1x128xf32>
    %210 = vector.broadcast %209 : vector<1x128xf32> to vector<8x128xf32>
    %211 = arith.addf %208, %210 : vector<8x128xf32>
    %212 = arith.addf %211, %204 : vector<8x128xf32>
    %cst_135 = arith.constant 0.000000e+00 : f32
    %213 = vector.broadcast %cst_135 : f32 to vector<8x128xf32>
    %214 = arith.maximumf %212, %213 : vector<8x128xf32>
    %215 = arith.truncf %214 : vector<8x128xf32> to vector<8x128xbf16>
    %c5_136 = arith.constant 5 : index
    %c2_137 = arith.constant 2 : index
    %c0_138 = arith.constant 0 : index
    %c0_139 = arith.constant 0 : index
    %216 = vector.load %arg4[%c5_136, %c2_137, %c0_138, %c0_139] : memref<8x3x128x128xbf16, #tpu.memory_space<vmem>>, vector<1x1x128x128xbf16>
    %217 = vector.shape_cast %216 : vector<1x1x128x128xbf16> to vector<128x128xbf16>
    %cst_140 = arith.constant dense<0.000000e+00> : vector<8x128xf32>
    %218 = tpu.matmul %215, %217, %cst_140 {dimension_numbers = #tpu.dot_dimension_numbers<[1], [0], [0], [1], [0, 0, 1, 1], [], []>} : vector<8x128xbf16>, vector<128x128xbf16>, vector<8x128xf32> -> vector<8x128xf32>
    %219 = vector.extract_strided_slice %195 {offsets = [2, 0], sizes = [1, 128], strides = [1, 1]} : vector<4x128xf32> to vector<1x128xf32>
    %220 = vector.broadcast %219 : vector<1x128xf32> to vector<8x128xf32>
    %221 = arith.addf %218, %220 : vector<8x128xf32>
    %222 = arith.addf %221, %214 : vector<8x128xf32>
    %223 = vector.extract_strided_slice %195 {offsets = [3, 0], sizes = [1, 128], strides = [1, 1]} : vector<4x128xf32> to vector<1x128xf32>
    %224 = vector.broadcast %223 : vector<1x128xf32> to vector<8x128xf32>
    %225 = arith.mulf %222, %224 : vector<8x128xf32>
    %cst_141 = arith.constant 0.000000e+00 : f32
    %226 = vector.broadcast %cst_141 : f32 to vector<8x128xf32>
    %227 = arith.addf %225, %226 : vector<8x128xf32>
    %c5_142 = arith.constant 5 : index
    %c0_143 = arith.constant 0 : index
    %c0_144 = arith.constant 0 : index
    %228 = vector.load %arg6[%c5_142, %c0_143, %c0_144] : memref<8x8x128xf32, #tpu.memory_space<vmem>>, vector<1x8x128xf32>
    %229 = vector.shape_cast %228 : vector<1x8x128xf32> to vector<8x128xf32>
    %230 = vector.shape_cast %227 : vector<8x128xf32> to vector<1x8x128xf32>
    tpu.vector_store %arg6[%c5_142, %c0_143, %c0_144], %230 {strides = array<i32>} : memref<8x8x128xf32, #tpu.memory_space<vmem>>, vector<1x8x128xf32>,
    %c6 = arith.constant 6 : index
    %c0_145 = arith.constant 0 : index
    %c0_146 = arith.constant 0 : index
    %231 = vector.load %arg5[%c6, %c0_145, %c0_146] : memref<8x4x128xf32, #tpu.memory_space<vmem>>, vector<1x4x128xf32>
    %232 = vector.shape_cast %231 : vector<1x4x128xf32> to vector<4x128xf32>
    %c6_147 = arith.constant 6 : index
    %c0_148 = arith.constant 0 : index
    %c0_149 = arith.constant 0 : index
    %c0_150 = arith.constant 0 : index
    %233 = vector.load %arg4[%c6_147, %c0_148, %c0_149, %c0_150] : memref<8x3x128x128xbf16, #tpu.memory_space<vmem>>, vector<1x1x128x128xbf16>
    %234 = vector.shape_cast %233 : vector<1x1x128x128xbf16> to vector<128x128xbf16>
    %cst_151 = arith.constant dense<0.000000e+00> : vector<8x128xf32>
    %235 = tpu.matmul %8, %234, %cst_151 {dimension_numbers = #tpu.dot_dimension_numbers<[1], [0], [0], [1], [0, 0, 1, 1], [], []>} : vector<8x128xbf16>, vector<128x128xbf16>, vector<8x128xf32> -> vector<8x128xf32>
    %236 = vector.extract_strided_slice %232 {offsets = [0, 0], sizes = [1, 128], strides = [1, 1]} : vector<4x128xf32> to vector<1x128xf32>
    %237 = vector.broadcast %236 : vector<1x128xf32> to vector<8x128xf32>
    %238 = arith.addf %235, %237 : vector<8x128xf32>
    %239 = arith.addf %238, %7 : vector<8x128xf32>
    %cst_152 = arith.constant 0.000000e+00 : f32
    %240 = vector.broadcast %cst_152 : f32 to vector<8x128xf32>
    %241 = arith.maximumf %239, %240 : vector<8x128xf32>
    %242 = arith.truncf %241 : vector<8x128xf32> to vector<8x128xbf16>
    %c6_153 = arith.constant 6 : index
    %c1_154 = arith.constant 1 : index
    %c0_155 = arith.constant 0 : index
    %c0_156 = arith.constant 0 : index
    %243 = vector.load %arg4[%c6_153, %c1_154, %c0_155, %c0_156] : memref<8x3x128x128xbf16, #tpu.memory_space<vmem>>, vector<1x1x128x128xbf16>
    %244 = vector.shape_cast %243 : vector<1x1x128x128xbf16> to vector<128x128xbf16>
    %cst_157 = arith.constant dense<0.000000e+00> : vector<8x128xf32>
    %245 = tpu.matmul %242, %244, %cst_157 {dimension_numbers = #tpu.dot_dimension_numbers<[1], [0], [0], [1], [0, 0, 1, 1], [], []>} : vector<8x128xbf16>, vector<128x128xbf16>, vector<8x128xf32> -> vector<8x128xf32>
    %246 = vector.extract_strided_slice %232 {offsets = [1, 0], sizes = [1, 128], strides = [1, 1]} : vector<4x128xf32> to vector<1x128xf32>
    %247 = vector.broadcast %246 : vector<1x128xf32> to vector<8x128xf32>
    %248 = arith.addf %245, %247 : vector<8x128xf32>
    %249 = arith.addf %248, %241 : vector<8x128xf32>
    %cst_158 = arith.constant 0.000000e+00 : f32
    %250 = vector.broadcast %cst_158 : f32 to vector<8x128xf32>
    %251 = arith.maximumf %249, %250 : vector<8x128xf32>
    %252 = arith.truncf %251 : vector<8x128xf32> to vector<8x128xbf16>
    %c6_159 = arith.constant 6 : index
    %c2_160 = arith.constant 2 : index
    %c0_161 = arith.constant 0 : index
    %c0_162 = arith.constant 0 : index
    %253 = vector.load %arg4[%c6_159, %c2_160, %c0_161, %c0_162] : memref<8x3x128x128xbf16, #tpu.memory_space<vmem>>, vector<1x1x128x128xbf16>
    %254 = vector.shape_cast %253 : vector<1x1x128x128xbf16> to vector<128x128xbf16>
    %cst_163 = arith.constant dense<0.000000e+00> : vector<8x128xf32>
    %255 = tpu.matmul %252, %254, %cst_163 {dimension_numbers = #tpu.dot_dimension_numbers<[1], [0], [0], [1], [0, 0, 1, 1], [], []>} : vector<8x128xbf16>, vector<128x128xbf16>, vector<8x128xf32> -> vector<8x128xf32>
    %256 = vector.extract_strided_slice %232 {offsets = [2, 0], sizes = [1, 128], strides = [1, 1]} : vector<4x128xf32> to vector<1x128xf32>
    %257 = vector.broadcast %256 : vector<1x128xf32> to vector<8x128xf32>
    %258 = arith.addf %255, %257 : vector<8x128xf32>
    %259 = arith.addf %258, %251 : vector<8x128xf32>
    %260 = vector.extract_strided_slice %232 {offsets = [3, 0], sizes = [1, 128], strides = [1, 1]} : vector<4x128xf32> to vector<1x128xf32>
    %261 = vector.broadcast %260 : vector<1x128xf32> to vector<8x128xf32>
    %262 = arith.mulf %259, %261 : vector<8x128xf32>
    %cst_164 = arith.constant 1.000000e+00 : f32
    %263 = vector.broadcast %cst_164 : f32 to vector<8x128xf32>
    %264 = arith.addf %262, %263 : vector<8x128xf32>
    %c6_165 = arith.constant 6 : index
    %c0_166 = arith.constant 0 : index
    %c0_167 = arith.constant 0 : index
    %265 = vector.load %arg6[%c6_165, %c0_166, %c0_167] : memref<8x8x128xf32, #tpu.memory_space<vmem>>, vector<1x8x128xf32>
    %266 = vector.shape_cast %265 : vector<1x8x128xf32> to vector<8x128xf32>
    %267 = vector.shape_cast %264 : vector<8x128xf32> to vector<1x8x128xf32>
    tpu.vector_store %arg6[%c6_165, %c0_166, %c0_167], %267 {strides = array<i32>} : memref<8x8x128xf32, #tpu.memory_space<vmem>>, vector<1x8x128xf32>,
    %c7 = arith.constant 7 : index
    %c0_168 = arith.constant 0 : index
    %c0_169 = arith.constant 0 : index
    %268 = vector.load %arg5[%c7, %c0_168, %c0_169] : memref<8x4x128xf32, #tpu.memory_space<vmem>>, vector<1x4x128xf32>
    %269 = vector.shape_cast %268 : vector<1x4x128xf32> to vector<4x128xf32>
    %c7_170 = arith.constant 7 : index
    %c0_171 = arith.constant 0 : index
    %c0_172 = arith.constant 0 : index
    %c0_173 = arith.constant 0 : index
    %270 = vector.load %arg4[%c7_170, %c0_171, %c0_172, %c0_173] : memref<8x3x128x128xbf16, #tpu.memory_space<vmem>>, vector<1x1x128x128xbf16>
    %271 = vector.shape_cast %270 : vector<1x1x128x128xbf16> to vector<128x128xbf16>
    %cst_174 = arith.constant dense<0.000000e+00> : vector<8x128xf32>
    %272 = tpu.matmul %8, %271, %cst_174 {dimension_numbers = #tpu.dot_dimension_numbers<[1], [0], [0], [1], [0, 0, 1, 1], [], []>} : vector<8x128xbf16>, vector<128x128xbf16>, vector<8x128xf32> -> vector<8x128xf32>
    %273 = vector.extract_strided_slice %269 {offsets = [0, 0], sizes = [1, 128], strides = [1, 1]} : vector<4x128xf32> to vector<1x128xf32>
    %274 = vector.broadcast %273 : vector<1x128xf32> to vector<8x128xf32>
    %275 = arith.addf %272, %274 : vector<8x128xf32>
    %276 = arith.addf %275, %7 : vector<8x128xf32>
    %cst_175 = arith.constant 0.000000e+00 : f32
    %277 = vector.broadcast %cst_175 : f32 to vector<8x128xf32>
    %278 = arith.maximumf %276, %277 : vector<8x128xf32>
    %279 = arith.truncf %278 : vector<8x128xf32> to vector<8x128xbf16>
    %c7_176 = arith.constant 7 : index
    %c1_177 = arith.constant 1 : index
    %c0_178 = arith.constant 0 : index
    %c0_179 = arith.constant 0 : index
    %280 = vector.load %arg4[%c7_176, %c1_177, %c0_178, %c0_179] : memref<8x3x128x128xbf16, #tpu.memory_space<vmem>>, vector<1x1x128x128xbf16>
    %281 = vector.shape_cast %280 : vector<1x1x128x128xbf16> to vector<128x128xbf16>
    %cst_180 = arith.constant dense<0.000000e+00> : vector<8x128xf32>
    %282 = tpu.matmul %279, %281, %cst_180 {dimension_numbers = #tpu.dot_dimension_numbers<[1], [0], [0], [1], [0, 0, 1, 1], [], []>} : vector<8x128xbf16>, vector<128x128xbf16>, vector<8x128xf32> -> vector<8x128xf32>
    %283 = vector.extract_strided_slice %269 {offsets = [1, 0], sizes = [1, 128], strides = [1, 1]} : vector<4x128xf32> to vector<1x128xf32>
    %284 = vector.broadcast %283 : vector<1x128xf32> to vector<8x128xf32>
    %285 = arith.addf %282, %284 : vector<8x128xf32>
    %286 = arith.addf %285, %278 : vector<8x128xf32>
    %cst_181 = arith.constant 0.000000e+00 : f32
    %287 = vector.broadcast %cst_181 : f32 to vector<8x128xf32>
    %288 = arith.maximumf %286, %287 : vector<8x128xf32>
    %289 = arith.truncf %288 : vector<8x128xf32> to vector<8x128xbf16>
    %c7_182 = arith.constant 7 : index
    %c2_183 = arith.constant 2 : index
    %c0_184 = arith.constant 0 : index
    %c0_185 = arith.constant 0 : index
    %290 = vector.load %arg4[%c7_182, %c2_183, %c0_184, %c0_185] : memref<8x3x128x128xbf16, #tpu.memory_space<vmem>>, vector<1x1x128x128xbf16>
    %291 = vector.shape_cast %290 : vector<1x1x128x128xbf16> to vector<128x128xbf16>
    %cst_186 = arith.constant dense<0.000000e+00> : vector<8x128xf32>
    %292 = tpu.matmul %289, %291, %cst_186 {dimension_numbers = #tpu.dot_dimension_numbers<[1], [0], [0], [1], [0, 0, 1, 1], [], []>} : vector<8x128xbf16>, vector<128x128xbf16>, vector<8x128xf32> -> vector<8x128xf32>
    %293 = vector.extract_strided_slice %269 {offsets = [2, 0], sizes = [1, 128], strides = [1, 1]} : vector<4x128xf32> to vector<1x128xf32>
    %294 = vector.broadcast %293 : vector<1x128xf32> to vector<8x128xf32>
    %295 = arith.addf %292, %294 : vector<8x128xf32>
    %296 = arith.addf %295, %288 : vector<8x128xf32>
    %297 = vector.extract_strided_slice %269 {offsets = [3, 0], sizes = [1, 128], strides = [1, 1]} : vector<4x128xf32> to vector<1x128xf32>
    %298 = vector.broadcast %297 : vector<1x128xf32> to vector<8x128xf32>
    %299 = arith.mulf %296, %298 : vector<8x128xf32>
    %cst_187 = arith.constant 0.000000e+00 : f32
    %300 = vector.broadcast %cst_187 : f32 to vector<8x128xf32>
    %301 = arith.addf %299, %300 : vector<8x128xf32>
    %c7_188 = arith.constant 7 : index
    %c0_189 = arith.constant 0 : index
    %c0_190 = arith.constant 0 : index
    %302 = vector.load %arg6[%c7_188, %c0_189, %c0_190] : memref<8x8x128xf32, #tpu.memory_space<vmem>>, vector<1x8x128xf32>
    %303 = vector.shape_cast %302 : vector<1x8x128xf32> to vector<8x128xf32>
    %304 = vector.shape_cast %301 : vector<8x128xf32> to vector<1x8x128xf32>
    tpu.vector_store %arg6[%c7_188, %c0_189, %c0_190], %304 {strides = array<i32>} : memref<8x8x128xf32, #tpu.memory_space<vmem>>, vector<1x8x128xf32>,
    return
  }
  func.func @transform_0(%arg0: i32) -> (i32, i32) {
    %c0_i32 = arith.constant 0 : i32
    %c0_i32_0 = arith.constant 0 : i32
    %c0_i32_1 = arith.constant 0 : i32
    return %c0_i32, %c0_i32_0 : i32, i32
  }
  func.func @transform_1(%arg0: i32) -> (i32, i32) {
    %c0_i32 = arith.constant 0 : i32
    %c0_i32_0 = arith.constant 0 : i32
    %c0_i32_1 = arith.constant 0 : i32
    return %c0_i32, %c0_i32_0 : i32, i32
  }
  func.func @transform_2(%arg0: i32) -> (i32, i32) {
    %c0_i32 = arith.constant 0 : i32
    %c0_i32_0 = arith.constant 0 : i32
    %c0_i32_1 = arith.constant 0 : i32
    return %c0_i32, %c0_i32_0 : i32, i32
  }
  func.func @transform_3(%arg0: i32) -> (i32, i32, i32, i32) {
    %c0_i32 = arith.constant 0 : i32
    %c0_i32_0 = arith.constant 0 : i32
    %c0_i32_1 = arith.constant 0 : i32
    %c0_i32_2 = arith.constant 0 : i32
    return %arg0, %c0_i32, %c0_i32_0, %c0_i32_1 : i32, i32, i32, i32
  }
  func.func @transform_4(%arg0: i32) -> (i32, i32, i32) {
    %c0_i32 = arith.constant 0 : i32
    %c0_i32_0 = arith.constant 0 : i32
    %c0_i32_1 = arith.constant 0 : i32
    return %arg0, %c0_i32, %c0_i32_0 : i32, i32, i32
  }
  func.func @transform_5(%arg0: i32) -> (i32, i32, i32) {
    %c0_i32 = arith.constant 0 : i32
    %c0_i32_0 = arith.constant 0 : i32
    %c0_i32_1 = arith.constant 0 : i32
    return %arg0, %c0_i32, %c0_i32_0 : i32, i32, i32
  }
}

</mosaic_0001>

<bundles_post_ra>
// kernel: film_adaptation_forward.2
= control target key start
LH: loop header
LB: loop body
LE: loop exit
PB: predicated region body
PF: predicated region fallthrough
CT: control target
= control target key end

     0   :  { %10 = vsyncpa [#allocation3], 0  ;;  %s1051_s21 = smov [#allocation2]   ;;  %s1052_s23 = smov 64   ;;  %s1172_s0 = inlined_call_operand.vmem [shape: bf16[8,64], index: 0, kind: input, shape index: {}]   ;;  %s1173_s1 = inlined_call_operand.vmem [shape: bf16[64,64], index: 1, kind: input, shape index: {}]   ;;  %s1174_s2 = inlined_call_operand.vmem [shape: f32[1,64], index: 2, kind: input, shape index: {}]   ;;  %s1175_s3 = inlined_call_operand.hbm [shape: bf16[4,3,64,64], index: 3, kind: input, shape index: {}]   ;;  %s1176_s4 = inlined_call_operand.vmem [shape: f32[4,4,64], index: 4, kind: input, shape index: {}]   ;;  %s1177_s5 = inlined_call_operand.vmem [shape: f32[4,8,64], index: 5, kind: output, shape index: {}]  }
   0x1   :  { %s21_s20 = sshll.u32 %s1175_s3, 4  ;;  %s23_s22 = sshll.u32 %s1051_s21, 4  ;;  %s22_s20 = int_to_ptr.hbm [resolvable:$true] %s21_s20  ;;  %s24_s22 = int_to_ptr.vmem [resolvable:$true] %s23_s22 }
   0x2   :  { %s1053_s24 = smov 4  }
   0x3   :  { %29 = dma.hbm_to_vmem [thread:$0]  %s22_s20, 6144, %s24_s22, [#allocation3], %s1052_s23, %s1052_s23, %s1053_s24  }
   0x4   :  { %1049 = dma.done.wait [#allocation3], 6144  }
   0x5   :  { %1050 = vsyncadd [#allocation3], 4294961152  ;;  %v972_v0 = vld [vmem:[%s1173_s1 + $0x18] sm:$0xff]  ;;  %v971_v2 = vld [vmem:[%s1173_s1 + $0x10] sm:$0xff]  ;;  %vm74_vm0 = vcmask 523264  }
   0x6   :  { %v976_v1 = vld [vmem:[#allocation2 + $0x18] sm:$0xff]  ;;  %82 = vmatpush.bf16.msra.mxu0 %v972_v0  ;;  %v975_v3 = vld [vmem:[#allocation2 + $0x10] sm:$0xff]  ;;  %v970_v4 = vld [vmem:[%s1173_s1 + $0x8] sm:$0xff] }
   0x7   :  { %134 = vmatpush.bf16.msra.mxu1 %v976_v1  ;;  %v969_v5 = vld [vmem:[%s1173_s1] sm:$0xff]  ;;  %v988_v6 = vld [vmem:[#allocation2 + $0x78] sm:$0xff]  ;;  %v987_v8 = vld [vmem:[#allocation2 + $0x70] sm:$0xff] }
   0x8   :  { %v37_v7 = vld [vmem:[%s1172_s0] sm:$0xf]  ;;  %v974_v9 = vld [vmem:[#allocation2 + $0x8] sm:$0xff]  ;;  %v980_v13 = vld [vmem:[#allocation2 + $0x38] sm:$0xff] }
   0x9   :  { %v986_v10 = vld [vmem:[#allocation2 + $0x68] sm:$0xff]  ;;  %v973_v11 = vld [vmem:[#allocation2] sm:$0xff]  ;;  %v992_v14 = vld [vmem:[#allocation2 + $0x98] sm:$0xff]  ;;  %187 = vmatpush.bf16.msra.mxu2 %v980_v13 }
   0xa   :  { %83 = vmatpush.bf16.msra.mxu0 %v971_v2  ;;  %v985_v12 = vld [vmem:[#allocation2 + $0x60] sm:$0xff]  ;;  %v979_v15 = vld [vmem:[#allocation2 + $0x30] sm:$0xff]  ;;  %v978_v23 = vld [vmem:[#allocation2 + $0x28] sm:$0xff] }
   0xb   :  { %135 = vmatpush.bf16.msra.mxu1 %v975_v3  ;;  %v991_v16 = vld [vmem:[#allocation2 + $0x90] sm:$0xff]  ;;  %v1024_v17 = vld [vmem:[%s1174_s2] ss:$0 sm:$0xff]  ;;  %v990_v24 = vld [vmem:[#allocation2 + $0x88] sm:$0xff] }
   0xc   :  { %v977_v25 = vld [vmem:[#allocation2 + $0x20] sm:$0xff]  ;;  %v996_v27 = vld [vmem:[#allocation2 + $0xb8] sm:$0xff]  ;;  %v995_v29 = vld [vmem:[#allocation2 + $0xb0] sm:$0xff] }
   0xd   :  { %188 = vmatpush.bf16.msra.mxu2 %v979_v15  ;;  %v989_v26 = vld [vmem:[#allocation2 + $0x80] sm:$0xff]  ;;  %v984_v28 = vld [vmem:[#allocation2 + $0x58] sm:$0xff]  ;;  %v994_v46 = vld [vmem:[#allocation2 + $0xa8] sm:$0xff] }
   0xe   :  { %84 = vmatpush.bf16.msra.mxu0 %v970_v4  ;;  %240 = vmatpush.bf16.msra.mxu3 %v984_v28  ;;  %v1119_v30 = vld [vmem:[%s1176_s4] sm:$0xf]  ;;  %v1124_v31 = vld [vmem:[%s1176_s4 + $0x4] sm:$0xf]  ;;  %v983_v47 = vld [vmem:[#allocation2 + $0x50] sm:$0xff] }
   0xf   :  { %136 = vmatpush.bf16.msra.mxu1 %v974_v9  ;;  %v102_v32 = vperm.slane %v1119_v30, 0  ;;  %v265_v33 = vperm.slane %v1124_v31, 0  ;;  %v993_v48 = vld [vmem:[#allocation2 + $0xa0] sm:$0xff]  ;;  %v982_v49 = vld [vmem:[#allocation2 + $0x48] sm:$0xff]  ;;  %v1012_v50 = vld [vmem:[#allocation2 + $0x138] sm:$0xff]  ;;  %v315_v59 = vperm.slane %v1124_v31, 1 }
  0x10   :  { %v981_v51 = vld [vmem:[#allocation2 + $0x40] sm:$0xff]  ;;  %v1011_v52 = vld [vmem:[#allocation2 + $0x130] sm:$0xff]  ;;  %v1000_v53 = vld [vmem:[#allocation2 + $0xd8] sm:$0xff]  ;;  %v155_v63 = vperm.slane %v1119_v30, 1 }
  0x11   :  { %189 = vmatpush.bf16.msra.mxu2 %v978_v23  ;;  %v1010_v54 = vld [vmem:[#allocation2 + $0x128] sm:$0xff]  ;;  %v999_v55 = vld [vmem:[#allocation2 + $0xd0] sm:$0xff]  ;;  %v1009_v56 = vld [vmem:[#allocation2 + $0x120] sm:$0xff]  ;;  %v410_v23 = vperm.slane %v1124_v31, 3 }
  0x12   :  { %85 = vmatpush.bf16.msra.mxu0 %v969_v5  ;;  %241 = vmatpush.bf16.msra.mxu3 %v983_v47  ;;  %v998_v57 = vld [vmem:[#allocation2 + $0xc8] sm:$0xff]  ;;  %v997_v58 = vld [vmem:[#allocation2 + $0xc0] sm:$0xff]  ;;  %v1016_v9 = vld [vmem:[#allocation2 + $0x158] sm:$0xff] }
  0x13   :  { %137 = vmatpush.bf16.msra.mxu1 %v973_v11  ;;  %v1004_v11 = vld [vmem:[#allocation2 + $0xf8] sm:$0xff]  ;;  %v1003_v13 = vld [vmem:[#allocation2 + $0xf0] sm:$0xff]  ;;  %v1002_v15 = vld [vmem:[#allocation2 + $0xe8] sm:$0xff] }
  0x15   :  { %758 = vmatmul.msk.bf16.vlgmr.msra.gmra.mxu0 %vm74_vm0, %v37_v7  ;;  %190 = vmatpush.bf16.msra.mxu2 %v977_v25  ;;  %v1019_v25 = vld [vmem:[#allocation2 + $0x170] sm:$0xff] }
  0x16   :  { %294 = vmatpush.bf16.msrb.mxu0 %v988_v6  ;;  %242 = vmatpush.bf16.msra.mxu3 %v982_v49 }
  0x17   :  { %347 = vmatpush.bf16.msrb.mxu1 %v992_v14  ;;  %v1013_v14 = vld [vmem:[#allocation2 + $0x140] sm:$0xff] }
  0x19   :  { %400 = vmatpush.bf16.msrb.mxu2 %v996_v27  ;;  %v208_v27 = vperm.slane %v1119_v30, 2 }
  0x1a   :  { %295 = vmatpush.bf16.msrb.mxu0 %v987_v8  ;;  %243 = vmatpush.bf16.msra.mxu3 %v981_v51 }
  0x1b   :  { %348 = vmatpush.bf16.msrb.mxu1 %v991_v16  ;;  %v1001_v16 = vld [vmem:[#allocation2 + $0xe0] sm:$0xff] }
  0x1d   :  { %401 = vmatpush.bf16.msrb.mxu2 %v995_v29 }
  0x1e   :  { %296 = vmatpush.bf16.msrb.mxu0 %v986_v10  ;;  %455 = vmatpush.bf16.msrb.mxu3 %v1000_v53  ;;  %v1015_v10 = vld [vmem:[#allocation2 + $0x150] sm:$0xff]  ;;  %v1006_v53 = vld [vmem:[#allocation2 + $0x108] sm:$0xff] }
  0x1f   :  { %349 = vmatpush.bf16.msrb.mxu1 %v990_v24  ;;  %v1007_v24 = vld [vmem:[#allocation2 + $0x110] sm:$0xff] }
  0x21   :  { %402 = vmatpush.bf16.msrb.mxu2 %v994_v46 }
  0x22   :  { %297 = vmatpush.bf16.msrb.mxu0 %v985_v12  ;;  %456 = vmatpush.bf16.msrb.mxu3 %v999_v55  ;;  %v1014_v12 = vld [vmem:[#allocation2 + $0x148] sm:$0xff]  ;;  %v1005_v55 = vld [vmem:[#allocation2 + $0x100] sm:$0xff] }
  0x23   :  { %350 = vmatpush.bf16.msrb.mxu1 %v989_v26 }
  0x25   :  { %403 = vmatpush.bf16.msrb.mxu2 %v993_v48 }
  0x26   :  { %457 = vmatpush.bf16.msrb.mxu3 %v998_v57  ;;  %508 = vmatpush.bf16.msra.mxu0 %v1004_v11 }
  0x2a   :  { %458 = vmatpush.bf16.msrb.mxu3 %v997_v58  ;;  %509 = vmatpush.bf16.msra.mxu0 %v1003_v13 }
  0x2e   :  { %510 = vmatpush.bf16.msra.mxu0 %v1002_v15 }
  0x32   :  { %511 = vmatpush.bf16.msra.mxu0 %v1001_v16 }
  0x92   :  { %v87_v18 = vpop.f32.mrf.mxu0 }
  0x93   :  { %v88_v19 = vadd.f32 %v1024_v17, %v87_v18  ;;  %v368_v17 = vperm.slane %v1124_v31, 2  ;;  %v1008_v18 = vld [vmem:[#allocation2 + $0x118] sm:$0xff] }
  0x95   :  { %v1106_v20 = vmax.f32 %v88_v19, 0.0  ;;  %v1020_v19 = vld [vmem:[#allocation2 + $0x178] sm:$0xff] }
  0x97   :  { %v1110_v21 = vpack.c.bf16 %v1106_v20, %v1106_v20 }
  0x99   :  { %775 = vmatmul.msk.bf16.vlgmr.msra.gmra.mxu1 %vm74_vm0, %v1110_v21  ;;  %827 = vmatmul.msk.bf16.vlgmr.msrb.gmra.mxu0 %vm74_vm0, %v1110_v21 }
  0x9a   :  { %v89_v22 = vpop.f32.mrf.mxu0  ;;  %561 = vmatpush.bf16.msra.mxu1 %v1008_v18  ;;  %722 = vmatpush.bf16.msrb.mxu0 %v1020_v19 }
  0x9e   :  { %562 = vmatpush.bf16.msra.mxu1 %v1007_v24  ;;  %723 = vmatpush.bf16.msrb.mxu0 %v1019_v25 }
  0xa2   :  { %563 = vmatpush.bf16.msra.mxu1 %v1006_v53 }
  0xa6   :  { %564 = vmatpush.bf16.msra.mxu1 %v1005_v55 }
 0x116   :  { %v139_v34 = vpop.f32.mrf.mxu1  ;;  %v299_v35 = vpop.f32.mrf.mxu0 }
 0x117   :  { %v140_v36 = vadd.f32 %v139_v34, %v102_v32  ;;  %v300_v37 = vadd.f32 %v299_v35, %v265_v33  ;;  %v250_v33 = vperm.slane %v1119_v30, 3  ;;  %v916_v35 = vld [vmem:[%s1176_s4 + $0xc] sm:$0xf]  ;;  %v863_v30 = vld [vmem:[%s1176_s4 + $0x8] sm:$0xf] }
 0x118   :  { %v476_v57 = vperm.slane %v863_v30, 1  ;;  %v637_v58 = vperm.slane %v916_v35, 1  ;;  %v571_v11 = vperm.slane %v863_v30, 3  ;;  %v732_v13 = vperm.slane %v916_v35, 3 }
 0x119   :  { %v143_v38 = vadd.f32 %v140_v36, %v1106_v20  ;;  %v303_v39 = vadd.f32 %v300_v37, %v1106_v20 }
 0x11b   :  { %v144_v40 = vmax.f32 %v143_v38, 0.0  ;;  %v304_v41 = vmax.f32 %v303_v39, 0.0  ;;  %v587_v38 = vperm.slane %v916_v35, 0 }
 0x11d   :  { %v305_v42 = vpack.c.bf16 %v304_v41, %v304_v41  ;;  %v145_v43 = vpack.c.bf16 %v144_v40, %v144_v40 }
 0x11e   :  { %v141_v44 = vpop.f32.mrf.mxu1  ;;  %v301_v45 = vpop.f32.mrf.mxu0 }
 0x11f   :  { %792 = vmatmul.msk.bf16.vlgmr.msra.gmra.mxu2 %vm74_vm0, %v145_v43  ;;  %844 = vmatmul.msk.bf16.vlgmr.msrb.gmra.mxu1 %vm74_vm0, %v305_v42  ;;  %v426_v43 = vperm.slane %v863_v30, 0 }
 0x120   :  { %616 = vmatpush.bf16.msra.mxu2 %v1012_v50 }
 0x124   :  { %617 = vmatpush.bf16.msra.mxu2 %v1011_v52 }
 0x128   :  { %618 = vmatpush.bf16.msra.mxu2 %v1010_v54  ;;  %v1018_v54 = vld [vmem:[#allocation2 + $0x168] sm:$0xff] }
 0x129   :  { %724 = vmatpush.bf16.msrb.mxu0 %v1018_v54 }
 0x12c   :  { %619 = vmatpush.bf16.msra.mxu2 %v1009_v56  ;;  %v1017_v56 = vld [vmem:[#allocation2 + $0x160] sm:$0xff] }
 0x12d   :  { %725 = vmatpush.bf16.msrb.mxu0 %v1017_v56 }
 0x19c   :  { %v352_v60 = vpop.f32.mrf.mxu1 }
 0x19d   :  { %v353_v61 = vadd.f32 %v352_v60, %v315_v59 }
 0x19f   :  { %v356_v62 = vadd.f32 %v353_v61, %v304_v41 }
 0x1a1   :  { %v357_v0 = vmax.f32 %v356_v62, 0.0 }
 0x1a2   :  { %v192_v1 = vpop.f32.mrf.mxu2 }
 0x1a3   :  { %v358_v2 = vpack.c.bf16 %v357_v0, %v357_v0  ;;  %v193_v3 = vadd.f32 %v192_v1, %v155_v63 }
 0x1a4   :  { %v354_v4 = vpop.f32.mrf.mxu1 }
 0x1a5   :  { %v196_v5 = vadd.f32 %v193_v3, %v144_v40  ;;  %861 = vmatmul.msk.bf16.vlgmr.msrb.gmra.mxu2 %vm74_vm0, %v358_v2 }
 0x1a7   :  { %v197_v6 = vmax.f32 %v196_v5, 0.0 }
 0x1a9   :  { %v198_v7 = vpack.c.bf16 %v197_v6, %v197_v6 }
 0x1aa   :  { %v194_v8 = vpop.f32.mrf.mxu2 }
 0x1ab   :  { %809 = vmatmul.msk.bf16.vlgmr.msra.gmra.mxu3 %vm74_vm0, %v198_v7  ;;  %v690_v7 = vperm.slane %v916_v35, 2 }
 0x1ac   :  { %669 = vmatpush.bf16.msra.mxu3 %v1016_v9 }
 0x1b0   :  { %670 = vmatpush.bf16.msra.mxu3 %v1015_v10 }
 0x1b4   :  { %671 = vmatpush.bf16.msra.mxu3 %v1014_v12 }
 0x1b5   :  { %933 = vmatmul.msk.bf16.vlgmr.msra.gmra.mxu2 %vm74_vm0, %v1110_v21 }
 0x1b8   :  { %672 = vmatpush.bf16.msra.mxu3 %v1013_v14 }
 0x1bb   :  { %880 = vmatmul.msk.bf16.vlgmr.msrb.gmra.mxu3 %vm74_vm0, %v1110_v21 }
 0x228   :  { %v405_v21 = vpop.f32.mrf.mxu2 }
 0x229   :  { %v406_v22 = vadd.f32 %v405_v21, %v368_v17 }
 0x22b   :  { %v409_v26 = vadd.f32 %v406_v22, %v357_v0 }
 0x22d   :  { %v411_v28 = vmul.f32 %v410_v23, %v409_v26 }
 0x22e   :  { %v245_v29 = vpop.f32.mrf.mxu3 }
 0x22f   :  { %862 = vst.msk [vmem:[%s1177_s5 + $0x8] sm:$0xff] %vm74_vm0, %v411_v28  ;;  %v246_v32 = vadd.f32 %v245_v29, %v208_v27 }
 0x230   :  { %v407_v31 = vpop.f32.mrf.mxu2 }
 0x231   :  { %v249_v34 = vadd.f32 %v246_v32, %v197_v6  ;;  %v529_v6 = vperm.slane %v863_v30, 2 }
 0x233   :  { %v251_v36 = vmul.f32 %v250_v33, %v249_v34 }
 0x235   :  { %v252_v37 = vadd.f32 1.0, %v251_v36 }
 0x236   :  { %v247_v39 = vpop.f32.mrf.mxu3 }
 0x237   :  { %253 = vst.msk [vmem:[%s1177_s5] sm:$0xff] %vm74_vm0, %v252_v37 }
 0x238   :  { %v621_v40 = vpop.f32.mrf.mxu2 }
 0x239   :  { %v622_v41 = vadd.f32 %v621_v40, %v587_v38 }
 0x23b   :  { %v625_v42 = vadd.f32 %v622_v41, %v1106_v20 }
 0x23d   :  { %v626_v44 = vmax.f32 %v625_v42, 0.0 }
 0x23e   :  { %v460_v45 = vpop.f32.mrf.mxu3 }
 0x23f   :  { %v627_v46 = vpack.c.bf16 %v626_v44, %v626_v44  ;;  %v461_v47 = vadd.f32 %v460_v45, %v426_v43 }
 0x240   :  { %v623_v48 = vpop.f32.mrf.mxu2 }
 0x241   :  { %v464_v49 = vadd.f32 %v461_v47, %v1106_v20  ;;  %950 = vmatmul.msk.bf16.vlgmr.msra.gmra.mxu3 %vm74_vm0, %v627_v46 }
 0x243   :  { %v465_v50 = vmax.f32 %v464_v49, 0.0 }
 0x245   :  { %v466_v51 = vpack.c.bf16 %v465_v50, %v465_v50 }
 0x246   :  { %v462_v52 = vpop.f32.mrf.mxu3 }
 0x247   :  { %897 = vmatmul.msk.bf16.vlgmr.msra.gmra.mxu0 %vm74_vm0, %v466_v51 }
 0x2c4   :  { %v513_v59 = vpop.f32.mrf.mxu0  ;;  %v674_v60 = vpop.f32.mrf.mxu3 }
 0x2c5   :  { %v514_v20 = vadd.f32 %v513_v59, %v476_v57  ;;  %v675_v61 = vadd.f32 %v674_v60, %v637_v58 }
 0x2c7   :  { %v517_v62 = vadd.f32 %v514_v20, %v465_v50  ;;  %v678_v63 = vadd.f32 %v675_v61, %v626_v44 }
 0x2c9   :  { %v518_v0 = vmax.f32 %v517_v62, 0.0  ;;  %v679_v1 = vmax.f32 %v678_v63, 0.0 }
 0x2cb   :  { %v519_v2 = vpack.c.bf16 %v518_v0, %v518_v0  ;;  %v680_v3 = vpack.c.bf16 %v679_v1, %v679_v1 }
 0x2cc   :  { %v515_v4 = vpop.f32.mrf.mxu0  ;;  %v676_v5 = vpop.f32.mrf.mxu3 }
 0x2cd   :  { %914 = vmatmul.msk.bf16.vlgmr.msra.gmra.mxu1 %vm74_vm0, %v519_v2  ;;  %967 = vmatmul.msk.bf16.vlgmr.msrb.gmra.mxu0 %vm74_vm0, %v680_v3 }
 0x34a   :  { %v566_v8 = vpop.f32.mrf.mxu1  ;;  %v727_v9 = vpop.f32.mrf.mxu0 }
 0x34b   :  { %v567_v10 = vadd.f32 %v566_v8, %v529_v6  ;;  %v728_v12 = vadd.f32 %v727_v9, %v690_v7 }
 0x34d   :  { %v570_v14 = vadd.f32 %v567_v10, %v518_v0  ;;  %v731_v15 = vadd.f32 %v728_v12, %v679_v1 }
 0x34f   :  { %v572_v16 = vmul.f32 %v571_v11, %v570_v14  ;;  %v733_v17 = vmul.f32 %v732_v13, %v731_v15 }
 0x351   :  { %v573_v18 = vadd.f32 1.0, %v572_v16  ;;  %968 = vst.msk [vmem:[%s1177_s5 + $0x18] sm:$0xff] %vm74_vm0, %v733_v17 }
 0x352   :  { %v568_v19 = vpop.f32.mrf.mxu1  ;;  %v729_v21 = vpop.f32.mrf.mxu0 }
 0x353   :  { %915 = vst.msk [vmem:[%s1177_s5 + $0x10] sm:$0xff] %vm74_vm0, %v573_v18 }
 0x354   :  { %741 = vsyncpa [#allocation3], 1 }

// kernel: film_adaptation_forward.3
= control target key start
LH: loop header
LB: loop body
LE: loop exit
PB: predicated region body
PF: predicated region fallthrough
CT: control target
= control target key end

     0   :  { %10 = vsyncpa [#allocation3], 0  ;;  %s3348_s0 = inlined_call_operand.vmem [shape: bf16[8,64], index: 0, kind: input, shape index: {}]   ;;  %s3349_s1 = inlined_call_operand.hbm [shape: bf16[64,128], index: 1, kind: input, shape index: {}]   ;;  %s3350_s2 = inlined_call_operand.vmem [shape: f32[1,128], index: 2, kind: input, shape index: {}]   ;;  %s3351_s3 = inlined_call_operand.hbm [shape: bf16[8,3,128,128], index: 3, kind: input, shape index: {}]   ;;  %s3352_s4 = inlined_call_operand.hbm [shape: f32[8,4,128], index: 4, kind: input, shape index: {}]   ;;  %s3353_s5 = inlined_call_operand.vmem [shape: f32[8,8,128], index: 5, kind: output, shape index: {}]  }
   0x1   :  { %11 = vsyncpa [#allocation5], 0  ;;  %s33_s20 = sshll.u32 %s3351_s3, 4  ;;  %s3205_s21 = smov [#allocation4]   ;;  %s34_s20 = int_to_ptr.hbm [resolvable:$true] %s33_s20 }
   0x2   :  { %s35_s22 = sshll.u32 %s3205_s21, 4  ;;  %s18_s25 = sshll.u32 %s3349_s1, 4  ;;  %s36_s22 = int_to_ptr.vmem [resolvable:$true] %s35_s22  ;;  %s19_s25 = int_to_ptr.hbm [resolvable:$true] %s18_s25 }
   0x3   :  { %s3206_s26 = smov 64   ;;  %s3207_s27 = smov 4  }
   0x4   :  { %41 = dma.hbm_to_vmem [thread:$0]  %s34_s20, 24576, %s36_s22, [#allocation5], %s3206_s26, %s3206_s26, %s3207_s27  }
   0x5   :  { %s3208_s28 = smov [#allocation2]   ;;  %s46_s7 = sshll.u32 %s3352_s4, 4  ;;  %s47_s7 = int_to_ptr.hbm [resolvable:$true] %s46_s7 }
   0x6   :  { %s20_s29 = sshll.u32 %s3208_s28, 4  ;;  %s3209_s3 = smov [#allocation6]   ;;  %s21_s29 = int_to_ptr.vmem [resolvable:$true] %s20_s29 }
   0x7   :  { %26 = dma.hbm_to_vmem [thread:$0]  %s19_s25, 512, %s21_s29, [#allocation3], %s3206_s26, %s3206_s26, %s3207_s27  }
   0x8   :  { %s48_s8 = sshll.u32 %s3209_s3, 4  ;;  %s49_s8 = int_to_ptr.vmem [resolvable:$true] %s48_s8 }
   0x9   :  { %54 = dma.hbm_to_vmem [thread:$0]  %s47_s7, 512, %s49_s8, [#allocation5], %s3206_s26, %s3206_s26, %s3207_s27  }
   0xa   :  { %3201 = dma.done.wait [#allocation3], 512  }
   0xb   :  { %3202 = vsyncadd [#allocation3], 4294966784 }
   0xc   :  { %3203 = dma.done.wait [#allocation5], 25088  }
   0xd   :  { %3204 = vsyncadd [#allocation5], 4294942208  ;;  %v2930_v0 = vld [vmem:[#allocation2 + $0x18] sm:$0xff]  ;;  %v2929_v2 = vld [vmem:[#allocation2 + $0x10] sm:$0xff]  ;;  %vm105_vm0 = vcmask 523264  }
   0xe   :  { %v2938_v1 = vld [vmem:[#allocation4 + $0x38] sm:$0xff]  ;;  %113 = vmatpush.bf16.msra.mxu0 %v2930_v0  ;;  %v2937_v3 = vld [vmem:[#allocation4 + $0x30] sm:$0xff]  ;;  %v2928_v4 = vld [vmem:[#allocation2 + $0x8] sm:$0xff] }
   0xf   :  { %190 = vmatpush.bf16.msra.mxu1 %v2938_v1  ;;  %v2936_v5 = vld [vmem:[#allocation4 + $0x28] sm:$0xff]  ;;  %v2927_v6 = vld [vmem:[#allocation2] sm:$0xff]  ;;  %v2962_v7 = vld [vmem:[#allocation4 + $0xf8] sm:$0xff] }
  0x10   :  { %v2935_v8 = vld [vmem:[#allocation4 + $0x20] sm:$0xff]  ;;  %v2961_v10 = vld [vmem:[#allocation4 + $0xf0] sm:$0xff]  ;;  %v2934_v11 = vld [vmem:[#allocation4 + $0x18] sm:$0xff] }
  0x11   :  { %v68_v9 = vld [vmem:[%s3348_s0] sm:$0xf]  ;;  %v2960_v12 = vld [vmem:[#allocation4 + $0xe8] sm:$0xff]  ;;  %v2933_v13 = vld [vmem:[#allocation4 + $0x10] sm:$0xff] }
  0x12   :  { %114 = vmatpush.bf16.msra.mxu0 %v2929_v2  ;;  %v2959_v14 = vld [vmem:[#allocation4 + $0xe0] sm:$0xff]  ;;  %v2958_v15 = vld [vmem:[#allocation4 + $0xd8] sm:$0xff]  ;;  %v2957_v16 = vld [vmem:[#allocation4 + $0xd0] sm:$0xff] }
  0x13   :  { %191 = vmatpush.bf16.msra.mxu1 %v2937_v3  ;;  %v2932_v17 = vld [vmem:[#allocation4 + $0x8] sm:$0xff]  ;;  %v2931_v19 = vld [vmem:[#allocation4] sm:$0xff]  ;;  %v2946_v21 = vld [vmem:[#allocation4 + $0x78] sm:$0xff] }
  0x14   :  { %v2956_v18 = vld [vmem:[#allocation4 + $0xc8] sm:$0xff]  ;;  %v2955_v20 = vld [vmem:[#allocation4 + $0xc0] sm:$0xff]  ;;  %v2970_v22 = vld [vmem:[#allocation4 + $0x138] sm:$0xff]  ;;  %272 = vmatpush.bf16.msra.mxu2 %v2946_v21 }
  0x15   :  { %v2945_v23 = vld [vmem:[#allocation4 + $0x70] sm:$0xff]  ;;  %v2944_v25 = vld [vmem:[#allocation4 + $0x68] sm:$0xff]  ;;  %v2943_v27 = vld [vmem:[#allocation4 + $0x60] sm:$0xff] }
  0x16   :  { %115 = vmatpush.bf16.msra.mxu0 %v2928_v4  ;;  %v2969_v24 = vld [vmem:[#allocation4 + $0x130] sm:$0xff]  ;;  %v2968_v26 = vld [vmem:[#allocation4 + $0x128] sm:$0xff]  ;;  %v2967_v28 = vld [vmem:[#allocation4 + $0x120] sm:$0xff] }
  0x17   :  { %192 = vmatpush.bf16.msra.mxu1 %v2936_v5  ;;  %v2942_v29 = vld [vmem:[#allocation4 + $0x58] sm:$0xff]  ;;  %v2941_v31 = vld [vmem:[#allocation4 + $0x50] sm:$0xff]  ;;  %v3128_v33 = vld [vmem:[%s3350_s2] ss:$0 sm:$0xff] }
  0x18   :  { %273 = vmatpush.bf16.msra.mxu2 %v2945_v23  ;;  %v2966_v30 = vld [vmem:[#allocation4 + $0x118] sm:$0xff]  ;;  %v2965_v32 = vld [vmem:[#allocation4 + $0x110] sm:$0xff]  ;;  %v2940_v39 = vld [vmem:[#allocation4 + $0x48] sm:$0xff] }
  0x19   :  { %v2964_v40 = vld [vmem:[#allocation4 + $0x108] sm:$0xff]  ;;  %v2939_v41 = vld [vmem:[#allocation4 + $0x40] sm:$0xff]  ;;  %v2978_v43 = vld [vmem:[#allocation4 + $0x178] sm:$0xff] }
  0x1a   :  { %116 = vmatpush.bf16.msra.mxu0 %v2927_v6  ;;  %v2963_v42 = vld [vmem:[#allocation4 + $0x100] sm:$0xff]  ;;  %v2954_v44 = vld [vmem:[#allocation4 + $0xb8] sm:$0xff]  ;;  %v2977_v45 = vld [vmem:[#allocation4 + $0x170] sm:$0xff] }
  0x1b   :  { %193 = vmatpush.bf16.msra.mxu1 %v2935_v8  ;;  %354 = vmatpush.bf16.msra.mxu3 %v2954_v44  ;;  %v2953_v46 = vld [vmem:[#allocation4 + $0xb0] sm:$0xff]  ;;  %v2976_v47 = vld [vmem:[#allocation4 + $0x168] sm:$0xff]  ;;  %v2975_v49 = vld [vmem:[#allocation4 + $0x160] sm:$0xff] }
  0x1c   :  { %274 = vmatpush.bf16.msra.mxu2 %v2944_v25  ;;  %v2952_v48 = vld [vmem:[#allocation4 + $0xa8] sm:$0xff]  ;;  %v2951_v50 = vld [vmem:[#allocation4 + $0xa0] sm:$0xff]  ;;  %v2974_v51 = vld [vmem:[#allocation4 + $0x158] sm:$0xff] }
  0x1d   :  { %2151 = vmatmul.msk.bf16.vlgmr.msra.gmra.mxu0 %vm105_vm0, %v68_v9  ;;  %v2950_v52 = vld [vmem:[#allocation4 + $0x98] sm:$0xff]  ;;  %v3263_v53 = vld [vmem:[#allocation6] sm:$0xf]  ;;  %v3265_v54 = vld [vmem:[#allocation6 + $0x4] sm:$0xf] }
  0x1e   :  { %440 = vmatpush.bf16.msrb.mxu0 %v2962_v7  ;;  %v2973_v55 = vld [vmem:[#allocation4 + $0x150] sm:$0xff]  ;;  %v141_v57 = vperm.slane %v3263_v53, 0  ;;  %v391_v58 = vperm.slane %v3265_v54, 0  ;;  %v2972_v59 = vld [vmem:[#allocation4 + $0x148] sm:$0xff]  ;;  %v2971_v3 = vld [vmem:[#allocation4 + $0x140] sm:$0xff] }
  0x1f   :  { %194 = vmatpush.bf16.msra.mxu1 %v2934_v11  ;;  %355 = vmatpush.bf16.msra.mxu3 %v2953_v46  ;;  %v2949_v56 = vld [vmem:[#allocation4 + $0x90] sm:$0xff]  ;;  %v2948_v60 = vld [vmem:[#allocation4 + $0x88] sm:$0xff]  ;;  %v2947_v4 = vld [vmem:[#allocation4 + $0x80] sm:$0xff] }
  0x20   :  { %275 = vmatpush.bf16.msra.mxu2 %v2943_v27  ;;  %v3010_v7 = vld [vmem:[#allocation4 + $0x278] sm:$0xff]  ;;  %v2981_v23 = vld [vmem:[#allocation4 + $0x190] sm:$0xff]  ;;  %v2980_v25 = vld [vmem:[#allocation4 + $0x188] sm:$0xff]  ;;  %v473_v27 = vperm.slane %v3265_v54, 1 }
  0x21   :  { %v2982_v21 = vld [vmem:[#allocation4 + $0x198] sm:$0xff]  ;;  %v3017_v44 = vld [vmem:[#allocation4 + $0x2b0] sm:$0xff]  ;;  %v3016_v46 = vld [vmem:[#allocation4 + $0x2a8] sm:$0xff] }
  0x22   :  { %441 = vmatpush.bf16.msrb.mxu0 %v2961_v10 }
  0x23   :  { %195 = vmatpush.bf16.msra.mxu1 %v2933_v13  ;;  %356 = vmatpush.bf16.msra.mxu3 %v2952_v48  ;;  %v2986_v13 = vld [vmem:[#allocation4 + $0x1b8] sm:$0xff]  ;;  %v3015_v48 = vld [vmem:[#allocation4 + $0x2a0] sm:$0xff] }
  0x24   :  { %276 = vmatpush.bf16.msra.mxu2 %v2942_v29 }
  0x26   :  { %442 = vmatpush.bf16.msrb.mxu0 %v2960_v12  ;;  %v3009_v12 = vld [vmem:[#allocation4 + $0x270] sm:$0xff] }
  0x27   :  { %196 = vmatpush.bf16.msra.mxu1 %v2932_v17  ;;  %357 = vmatpush.bf16.msra.mxu3 %v2951_v50  ;;  %v2984_v17 = vld [vmem:[#allocation4 + $0x1a8] sm:$0xff]  ;;  %v3014_v50 = vld [vmem:[#allocation4 + $0x298] sm:$0xff] }
  0x28   :  { %277 = vmatpush.bf16.msra.mxu2 %v2941_v31  ;;  %v223_v31 = vperm.slane %v3263_v53, 1 }
  0x2a   :  { %443 = vmatpush.bf16.msrb.mxu0 %v2959_v14  ;;  %v3008_v14 = vld [vmem:[#allocation4 + $0x268] sm:$0xff] }
  0x2b   :  { %197 = vmatpush.bf16.msra.mxu1 %v2931_v19  ;;  %358 = vmatpush.bf16.msra.mxu3 %v2950_v52  ;;  %v2983_v19 = vld [vmem:[#allocation4 + $0x1a0] sm:$0xff]  ;;  %v3013_v52 = vld [vmem:[#allocation4 + $0x290] sm:$0xff] }
  0x2c   :  { %278 = vmatpush.bf16.msra.mxu2 %v2940_v39 }
  0x2e   :  { %444 = vmatpush.bf16.msrb.mxu0 %v2958_v15  ;;  %v2985_v15 = vld [vmem:[#allocation4 + $0x1b0] sm:$0xff] }
  0x2f   :  { %522 = vmatpush.bf16.msrb.mxu1 %v2970_v22  ;;  %359 = vmatpush.bf16.msra.mxu3 %v2949_v56  ;;  %v3004_v22 = vld [vmem:[#allocation4 + $0x248] sm:$0xff] }
  0x30   :  { %279 = vmatpush.bf16.msra.mxu2 %v2939_v41  ;;  %v3018_v41 = vld [vmem:[#allocation4 + $0x2b8] sm:$0xff]  ;;  %v3012_v56 = vld [vmem:[#allocation4 + $0x288] sm:$0xff] }
  0x32   :  { %445 = vmatpush.bf16.msrb.mxu0 %v2957_v16  ;;  %v3007_v16 = vld [vmem:[#allocation4 + $0x260] sm:$0xff] }
  0x33   :  { %523 = vmatpush.bf16.msrb.mxu1 %v2969_v24  ;;  %360 = vmatpush.bf16.msra.mxu3 %v2948_v60  ;;  %v3003_v24 = vld [vmem:[#allocation4 + $0x240] sm:$0xff] }
  0x34   :  { %604 = vmatpush.bf16.msrb.mxu2 %v2978_v43  ;;  %v2987_v60 = vld [vmem:[#allocation4 + $0x1c0] sm:$0xff] }
  0x36   :  { %446 = vmatpush.bf16.msrb.mxu0 %v2956_v18  ;;  %v3006_v18 = vld [vmem:[#allocation4 + $0x258] sm:$0xff] }
  0x37   :  { %524 = vmatpush.bf16.msrb.mxu1 %v2968_v26  ;;  %361 = vmatpush.bf16.msra.mxu3 %v2947_v4  ;;  %v2979_v26 = vld [vmem:[#allocation4 + $0x180] sm:$0xff]  ;;  %v3025_v4 = vld [vmem:[#allocation4 + $0x2f0] sm:$0xff] }
  0x38   :  { %605 = vmatpush.bf16.msrb.mxu2 %v2977_v45  ;;  %v2994_v45 = vld [vmem:[#allocation4 + $0x1f8] sm:$0xff] }
  0x3a   :  { %447 = vmatpush.bf16.msrb.mxu0 %v2955_v20  ;;  %v3005_v20 = vld [vmem:[#allocation4 + $0x250] sm:$0xff] }
  0x3b   :  { %525 = vmatpush.bf16.msrb.mxu1 %v2967_v28  ;;  %691 = vmatpush.bf16.msrb.mxu3 %v2986_v13 }
  0x3c   :  { %606 = vmatpush.bf16.msrb.mxu2 %v2976_v47  ;;  %v2993_v47 = vld [vmem:[#allocation4 + $0x1f0] sm:$0xff] }
  0x3e   :  { %773 = vmatpush.bf16.msra.mxu0 %v2994_v45 }
  0x3f   :  { %526 = vmatpush.bf16.msrb.mxu1 %v2966_v30  ;;  %692 = vmatpush.bf16.msrb.mxu3 %v2985_v15  ;;  %v3023_v15 = vld [vmem:[#allocation4 + $0x2e0] sm:$0xff] }
  0x40   :  { %607 = vmatpush.bf16.msrb.mxu2 %v2975_v49  ;;  %v2992_v49 = vld [vmem:[#allocation4 + $0x1e8] sm:$0xff] }
  0x42   :  { %774 = vmatpush.bf16.msra.mxu0 %v2993_v47  ;;  %v3057_v47 = vld [vmem:[#allocation4 + $0x3f0] sm:$0xff] }
  0x43   :  { %527 = vmatpush.bf16.msrb.mxu1 %v2965_v32  ;;  %693 = vmatpush.bf16.msrb.mxu3 %v2984_v17 }
  0x44   :  { %608 = vmatpush.bf16.msrb.mxu2 %v2974_v51  ;;  %v2991_v51 = vld [vmem:[#allocation4 + $0x1e0] sm:$0xff] }
  0x46   :  { %775 = vmatpush.bf16.msra.mxu0 %v2992_v49  ;;  %v3056_v49 = vld [vmem:[#allocation4 + $0x3e8] sm:$0xff] }
  0x47   :  { %528 = vmatpush.bf16.msrb.mxu1 %v2964_v40  ;;  %694 = vmatpush.bf16.msrb.mxu3 %v2983_v19 }
  0x48   :  { %609 = vmatpush.bf16.msrb.mxu2 %v2973_v55  ;;  %v2990_v55 = vld [vmem:[#allocation4 + $0x1d8] sm:$0xff] }
  0x4a   :  { %776 = vmatpush.bf16.msra.mxu0 %v2991_v51  ;;  %v3055_v51 = vld [vmem:[#allocation4 + $0x3e0] sm:$0xff] }
  0x4b   :  { %529 = vmatpush.bf16.msrb.mxu1 %v2963_v42  ;;  %695 = vmatpush.bf16.msrb.mxu3 %v2982_v21  ;;  %v3022_v21 = vld [vmem:[#allocation4 + $0x2d8] sm:$0xff] }
  0x4c   :  { %610 = vmatpush.bf16.msrb.mxu2 %v2972_v59  ;;  %v2988_v59 = vld [vmem:[#allocation4 + $0x1c8] sm:$0xff] }
  0x4e   :  { %777 = vmatpush.bf16.msra.mxu0 %v2990_v55  ;;  %v3054_v55 = vld [vmem:[#allocation4 + $0x3d8] sm:$0xff] }
  0x4f   :  { %696 = vmatpush.bf16.msrb.mxu3 %v2981_v23  ;;  %v3288_v23 = vld [vmem:[#allocation6 + $0x8] sm:$0xf] }
  0x50   :  { %611 = vmatpush.bf16.msrb.mxu2 %v2971_v3  ;;  %v3001_v3 = vld [vmem:[#allocation4 + $0x230] sm:$0xff] }
  0x53   :  { %697 = vmatpush.bf16.msrb.mxu3 %v2980_v25  ;;  %v2997_v25 = vld [vmem:[#allocation4 + $0x210] sm:$0xff] }
  0x57   :  { %698 = vmatpush.bf16.msrb.mxu3 %v2979_v26  ;;  %v3021_v26 = vld [vmem:[#allocation4 + $0x2d0] sm:$0xff] }
  0x9a   :  { %v118_v34 = vpop.f32.mrf.mxu0 }
  0x9b   :  { %v119_v35 = vadd.f32 %v3128_v33, %v118_v34 }
  0x9d   :  { %v3255_v36 = vmax.f32 %v119_v35, 0.0 }
  0x9f   :  { %v3259_v37 = vpack.c.bf16 %v3255_v36, %v3255_v36 }
  0xa1   :  { %198 = vmatmul.bf16.vlgmr.msra.gmra.mxu1 %v3259_v37  ;;  %448 = vmatmul.bf16.vlgmr.msrb.gmra.mxu0 %v3259_v37 }
  0xa2   :  { %v120_v38 = vpop.f32.mrf.mxu0 }
 0x11e   :  { %v199_v61 = vpop.f32.mrf.mxu1  ;;  %v449_v62 = vpop.f32.mrf.mxu0 }
 0x11f   :  { %v200_v63 = vadd.f32 %v199_v61, %v141_v57  ;;  %v450_v0 = vadd.f32 %v449_v62, %v391_v58  ;;  %v2989_v57 = vld [vmem:[#allocation4 + $0x1d0] sm:$0xff]  ;;  %v3011_v58 = vld [vmem:[#allocation4 + $0x280] sm:$0xff]  ;;  %v555_v61 = vperm.slane %v3265_v54, 2  ;;  %v3002_v62 = vld [vmem:[#allocation4 + $0x238] sm:$0xff] }
 0x120   :  { %778 = vmatpush.bf16.msra.mxu0 %v2989_v57  ;;  %855 = vmatpush.bf16.msra.mxu1 %v3002_v62  ;;  %v3053_v57 = vld [vmem:[#allocation4 + $0x3d0] sm:$0xff]  ;;  %v3042_v62 = vld [vmem:[#allocation4 + $0x378] sm:$0xff] }
 0x121   :  { %v203_v1 = vadd.f32 %v200_v63, %v3255_v36  ;;  %v453_v2 = vadd.f32 %v450_v0, %v3255_v36  ;;  %v3026_v63 = vld [vmem:[#allocation4 + $0x2f8] sm:$0xff] }
 0x123   :  { %v204_v5 = vmax.f32 %v203_v1, 0.0  ;;  %v454_v6 = vmax.f32 %v453_v2, 0.0  ;;  %v618_v2 = vperm.slane %v3265_v54, 3  ;;  %v368_v54 = vperm.slane %v3263_v53, 3 }
 0x124   :  { %779 = vmatpush.bf16.msra.mxu0 %v2988_v59  ;;  %856 = vmatpush.bf16.msra.mxu1 %v3001_v3  ;;  %v3052_v59 = vld [vmem:[#allocation4 + $0x3c8] sm:$0xff] }
 0x125   :  { %v205_v8 = vpack.c.bf16 %v204_v5, %v204_v5  ;;  %v455_v9 = vpack.c.bf16 %v454_v6, %v454_v6 }
 0x126   :  { %v201_v10 = vpop.f32.mrf.mxu1  ;;  %v451_v11 = vpop.f32.mrf.mxu0 }
 0x127   :  { %280 = vmatmul.bf16.vlgmr.msra.gmra.mxu2 %v205_v8  ;;  %530 = vmatmul.bf16.vlgmr.msrb.gmra.mxu1 %v455_v9  ;;  %v3000_v8 = vld [vmem:[#allocation4 + $0x228] sm:$0xff] }
 0x128   :  { %942 = vmatpush.bf16.msra.mxu2 %v3010_v7  ;;  %780 = vmatpush.bf16.msra.mxu0 %v2987_v60  ;;  %v3024_v9 = vld [vmem:[#allocation4 + $0x2e8] sm:$0xff]  ;;  %v3027_v60 = vld [vmem:[#allocation4 + $0x300] sm:$0xff] }
 0x129   :  { %857 = vmatpush.bf16.msra.mxu1 %v3000_v8 }
 0x12c   :  { %943 = vmatpush.bf16.msra.mxu2 %v3009_v12  ;;  %1106 = vmatpush.bf16.msrb.mxu0 %v3026_v63  ;;  %v3041_v63 = vld [vmem:[#allocation4 + $0x370] sm:$0xff] }
 0x130   :  { %944 = vmatpush.bf16.msra.mxu2 %v3008_v14  ;;  %1107 = vmatpush.bf16.msrb.mxu0 %v3025_v4  ;;  %v2999_v14 = vld [vmem:[#allocation4 + $0x220] sm:$0xff] }
 0x131   :  { %858 = vmatpush.bf16.msra.mxu1 %v2999_v14  ;;  %v3065_v14 = vld [vmem:[#allocation4 + $0x430] sm:$0xff] }
 0x134   :  { %945 = vmatpush.bf16.msra.mxu2 %v3007_v16  ;;  %1108 = vmatpush.bf16.msrb.mxu0 %v3024_v9  ;;  %v3282_v16 = vld [vmem:[#allocation6 + $0xc] sm:$0xf] }
 0x135   :  { %v893_v19 = vperm.slane %v3282_v16, 0 }
 0x138   :  { %946 = vmatpush.bf16.msra.mxu2 %v3006_v18  ;;  %1109 = vmatpush.bf16.msrb.mxu0 %v3023_v15  ;;  %v3040_v15 = vld [vmem:[#allocation4 + $0x368] sm:$0xff] }
 0x13c   :  { %947 = vmatpush.bf16.msra.mxu2 %v3005_v20  ;;  %v2998_v20 = vld [vmem:[#allocation4 + $0x218] sm:$0xff]  ;;  %1110 = vmatpush.bf16.msrb.mxu0 %v3022_v21 }
 0x13d   :  { %859 = vmatpush.bf16.msra.mxu1 %v2998_v20  ;;  %v3038_v20 = vld [vmem:[#allocation4 + $0x358] sm:$0xff] }
 0x13e   :  { %v3062_v21 = vld [vmem:[#allocation4 + $0x418] sm:$0xff] }
 0x140   :  { %948 = vmatpush.bf16.msra.mxu2 %v3004_v22  ;;  %1111 = vmatpush.bf16.msrb.mxu0 %v3021_v26  ;;  %v3035_v26 = vld [vmem:[#allocation4 + $0x340] sm:$0xff] }
 0x141   :  { %860 = vmatpush.bf16.msra.mxu1 %v2997_v25  ;;  %v3060_v25 = vld [vmem:[#allocation4 + $0x408] sm:$0xff] }
 0x144   :  { %949 = vmatpush.bf16.msra.mxu2 %v3003_v24 }
 0x1a4   :  { %v531_v28 = vpop.f32.mrf.mxu1 }
 0x1a5   :  { %v532_v29 = vadd.f32 %v531_v28, %v473_v27  ;;  %v642_v28 = vperm.slane %v3288_v23, 0 }
 0x1a7   :  { %v535_v30 = vadd.f32 %v532_v29, %v454_v6  ;;  %v305_v6 = vperm.slane %v3263_v53, 2 }
 0x1a9   :  { %v536_v32 = vmax.f32 %v535_v30, 0.0  ;;  %v2996_v30 = vld [vmem:[#allocation4 + $0x208] sm:$0xff] }
 0x1aa   :  { %v281_v33 = vpop.f32.mrf.mxu2  ;;  %861 = vmatpush.bf16.msra.mxu1 %v2996_v30  ;;  %v3073_v30 = vld [vmem:[#allocation4 + $0x470] sm:$0xff] }
 0x1ab   :  { %v282_v34 = vadd.f32 %v281_v33, %v223_v31  ;;  %v537_v35 = vpack.c.bf16 %v536_v32, %v536_v32 }
 0x1ac   :  { %v533_v38 = vpop.f32.mrf.mxu1 }
 0x1ad   :  { %v285_v39 = vadd.f32 %v282_v34, %v204_v5  ;;  %612 = vmatmul.bf16.vlgmr.msrb.gmra.mxu2 %v537_v35 }
 0x1ae   :  { %1275 = vmatpush.bf16.msrb.mxu2 %v3042_v62  ;;  %v3044_v62 = vld [vmem:[#allocation4 + $0x388] sm:$0xff] }
 0x1af   :  { %v286_v40 = vmax.f32 %v285_v39, 0.0  ;;  %v2995_v39 = vld [vmem:[#allocation4 + $0x200] sm:$0xff] }
 0x1b0   :  { %862 = vmatpush.bf16.msra.mxu1 %v2995_v39 }
 0x1b1   :  { %v287_v42 = vpack.c.bf16 %v286_v40, %v286_v40 }
 0x1b2   :  { %v283_v43 = vpop.f32.mrf.mxu2  ;;  %1276 = vmatpush.bf16.msrb.mxu2 %v3041_v63 }
 0x1b3   :  { %362 = vmatmul.bf16.vlgmr.msra.gmra.mxu3 %v287_v42  ;;  %v3058_v43 = vld [vmem:[#allocation4 + $0x3f8] sm:$0xff] }
 0x1b4   :  { %1024 = vmatpush.bf16.msra.mxu3 %v3018_v41  ;;  %v3034_v41 = vld [vmem:[#allocation4 + $0x338] sm:$0xff] }
 0x1b5   :  { %1193 = vmatpush.bf16.msrb.mxu1 %v3034_v41  ;;  %v869_v41 = vperm.slane %v3288_v23, 3 }
 0x1b6   :  { %1277 = vmatpush.bf16.msrb.mxu2 %v3040_v15  ;;  %v3104_v15 = vld [vmem:[#allocation4 + $0x568] sm:$0xff] }
 0x1b8   :  { %1025 = vmatpush.bf16.msra.mxu3 %v3017_v44 }
 0x1bc   :  { %1026 = vmatpush.bf16.msra.mxu3 %v3016_v46  ;;  %v3033_v46 = vld [vmem:[#allocation4 + $0x330] sm:$0xff] }
 0x1bd   :  { %950 = vmatmul.bf16.vlgmr.msra.gmra.mxu2 %v3259_v37  ;;  %1194 = vmatpush.bf16.msrb.mxu1 %v3033_v46  ;;  %v3071_v46 = vld [vmem:[#allocation4 + $0x460] sm:$0xff] }
 0x1c0   :  { %1027 = vmatpush.bf16.msra.mxu3 %v3015_v48  ;;  %v3032_v48 = vld [vmem:[#allocation4 + $0x328] sm:$0xff] }
 0x1c1   :  { %1195 = vmatpush.bf16.msrb.mxu1 %v3032_v48 }
 0x1c3   :  { %699 = vmatmul.bf16.vlgmr.msrb.gmra.mxu3 %v3259_v37 }
 0x1c4   :  { %1028 = vmatpush.bf16.msra.mxu3 %v3014_v50  ;;  %v3031_v50 = vld [vmem:[#allocation4 + $0x320] sm:$0xff] }
 0x1c5   :  { %1196 = vmatpush.bf16.msrb.mxu1 %v3031_v50 }
 0x1c8   :  { %1029 = vmatpush.bf16.msra.mxu3 %v3013_v52  ;;  %v3030_v52 = vld [vmem:[#allocation4 + $0x318] sm:$0xff] }
 0x1c9   :  { %1197 = vmatpush.bf16.msrb.mxu1 %v3030_v52 }
 0x1cc   :  { %1030 = vmatpush.bf16.msra.mxu3 %v3012_v56  ;;  %v3029_v56 = vld [vmem:[#allocation4 + $0x310] sm:$0xff] }
 0x1cd   :  { %1198 = vmatpush.bf16.msrb.mxu1 %v3029_v56  ;;  %v3314_v56 = vld [vmem:[#allocation6 + $0x14] sm:$0xf] }
 0x1d0   :  { %1031 = vmatpush.bf16.msra.mxu3 %v3011_v58  ;;  %v3028_v58 = vld [vmem:[#allocation4 + $0x308] sm:$0xff] }
 0x1d1   :  { %1199 = vmatpush.bf16.msrb.mxu1 %v3028_v58  ;;  %v3045_v58 = vld [vmem:[#allocation4 + $0x390] sm:$0xff] }
 0x1d5   :  { %1200 = vmatpush.bf16.msrb.mxu1 %v3027_v60  ;;  %v1395_v60 = vperm.slane %v3314_v56, 0 }
 0x230   :  { %v613_v0 = vpop.f32.mrf.mxu2 }
 0x231   :  { %v614_v1 = vadd.f32 %v613_v0, %v555_v61  ;;  %v3051_v61 = vld [vmem:[#allocation4 + $0x3c0] sm:$0xff]  ;;  %v724_v0 = vperm.slane %v3288_v23, 1 }
 0x233   :  { %v617_v5 = vadd.f32 %v614_v1, %v536_v32  ;;  %v3020_v32 = vld [vmem:[#allocation4 + $0x2c8] sm:$0xff]  ;;  %v975_v1 = vperm.slane %v3282_v16, 1 }
 0x234   :  { %1112 = vmatpush.bf16.msrb.mxu0 %v3020_v32  ;;  %v806_v32 = vperm.slane %v3288_v23, 2  ;;  %v3046_v23 = vld [vmem:[#allocation4 + $0x398] sm:$0xff] }
 0x235   :  { %v619_v7 = vmul.f32 %v618_v2, %v617_v5 }
 0x236   :  { %v363_v10 = vpop.f32.mrf.mxu3 }
 0x237   :  { %2344 = vst [vmem:[%s3353_s5 + $0x8] sm:$0xff] %v619_v7  ;;  %v364_v11 = vadd.f32 %v363_v10, %v305_v6  ;;  %v3066_v10 = vld [vmem:[#allocation4 + $0x438] sm:$0xff] }
 0x238   :  { %v615_v12 = vpop.f32.mrf.mxu2 }
 0x239   :  { %v367_v13 = vadd.f32 %v364_v11, %v286_v40  ;;  %v3019_v40 = vld [vmem:[#allocation4 + $0x2c0] sm:$0xff] }
 0x23a   :  { %1113 = vmatpush.bf16.msrb.mxu0 %v3019_v40 }
 0x23b   :  { %v369_v17 = vmul.f32 %v368_v54, %v367_v13 }
 0x23d   :  { %v370_v18 = vadd.f32 1.0, %v369_v17  ;;  %v3064_v17 = vld [vmem:[#allocation4 + $0x428] sm:$0xff] }
 0x23e   :  { %v365_v22 = vpop.f32.mrf.mxu3 }
 0x23f   :  { %371 = vst [vmem:[%s3353_s5] sm:$0xff] %v370_v18  ;;  %v3039_v18 = vld [vmem:[#allocation4 + $0x360] sm:$0xff]  ;;  %v3037_v22 = vld [vmem:[#allocation4 + $0x350] sm:$0xff] }
 0x240   :  { %v951_v53 = vpop.f32.mrf.mxu2  ;;  %1278 = vmatpush.bf16.msrb.mxu2 %v3039_v18  ;;  %v3103_v18 = vld [vmem:[#allocation4 + $0x560] sm:$0xff] }
 0x241   :  { %v952_v24 = vadd.f32 %v951_v53, %v893_v19  ;;  %v3063_v19 = vld [vmem:[#allocation4 + $0x420] sm:$0xff]  ;;  %v3061_v53 = vld [vmem:[#allocation4 + $0x410] sm:$0xff] }
 0x243   :  { %v955_v27 = vadd.f32 %v952_v24, %v3255_v36  ;;  %v3036_v24 = vld [vmem:[#allocation4 + $0x348] sm:$0xff] }
 0x244   :  { %1279 = vmatpush.bf16.msrb.mxu2 %v3038_v20  ;;  %v3102_v20 = vld [vmem:[#allocation4 + $0x558] sm:$0xff] }
 0x245   :  { %v3292_v29 = vmax.f32 %v955_v27, 0.0  ;;  %v3059_v27 = vld [vmem:[#allocation4 + $0x400] sm:$0xff] }
 0x246   :  { %v700_v31 = vpop.f32.mrf.mxu3 }
 0x247   :  { %v957_v33 = vpack.c.bf16 %v3292_v29, %v3292_v29  ;;  %v701_v34 = vadd.f32 %v700_v31, %v642_v28  ;;  %v3074_v28 = vld [vmem:[#allocation4 + $0x478] sm:$0xff]  ;;  %v3049_v31 = vld [vmem:[#allocation4 + $0x3b0] sm:$0xff] }
 0x248   :  { %v953_v35 = vpop.f32.mrf.mxu2  ;;  %1280 = vmatpush.bf16.msrb.mxu2 %v3037_v22  ;;  %v3101_v22 = vld [vmem:[#allocation4 + $0x550] sm:$0xff] }
 0x249   :  { %v704_v38 = vadd.f32 %v701_v34, %v3255_v36  ;;  %1032 = vmatmul.bf16.vlgmr.msra.gmra.mxu3 %v957_v33  ;;  %v1057_v33 = vperm.slane %v3282_v16, 2  ;;  %v3072_v34 = vld [vmem:[#allocation4 + $0x468] sm:$0xff] }
 0x24a   :  { %v3048_v35 = vld [vmem:[#allocation4 + $0x3a8] sm:$0xff] }
 0x24b   :  { %v705_v42 = vmax.f32 %v704_v38, 0.0 }
 0x24c   :  { %1281 = vmatpush.bf16.msrb.mxu2 %v3036_v24  ;;  %v3100_v24 = vld [vmem:[#allocation4 + $0x548] sm:$0xff] }
 0x24d   :  { %v706_v44 = vpack.c.bf16 %v705_v42, %v705_v42 }
 0x24e   :  { %v702_v45 = vpop.f32.mrf.mxu3 }
 0x24f   :  { %781 = vmatmul.bf16.vlgmr.msra.gmra.mxu0 %v706_v44 }
 0x250   :  { %1444 = vmatpush.bf16.msra.mxu0 %v3058_v43  ;;  %1282 = vmatpush.bf16.msrb.mxu2 %v3035_v26  ;;  %v1120_v43 = vperm.slane %v3282_v16, 3  ;;  %v3312_v16 = vld [vmem:[#allocation6 + $0x10] sm:$0xf]  ;;  %v3099_v26 = vld [vmem:[#allocation4 + $0x540] sm:$0xff] }
 0x254   :  { %1445 = vmatpush.bf16.msra.mxu0 %v3057_v47  ;;  %1608 = vmatpush.bf16.msra.mxu2 %v3074_v28  ;;  %v3047_v47 = vld [vmem:[#allocation4 + $0x3a0] sm:$0xff] }
 0x255   :  { %v3075_v28 = vld [vmem:[#allocation4 + $0x480] sm:$0xff] }
 0x258   :  { %1446 = vmatpush.bf16.msra.mxu0 %v3056_v49  ;;  %1609 = vmatpush.bf16.msra.mxu2 %v3073_v30 }
 0x25c   :  { %1447 = vmatpush.bf16.msra.mxu0 %v3055_v51  ;;  %1610 = vmatpush.bf16.msra.mxu2 %v3072_v34  ;;  %v3070_v51 = vld [vmem:[#allocation4 + $0x458] sm:$0xff] }
 0x260   :  { %1448 = vmatpush.bf16.msra.mxu0 %v3054_v55  ;;  %1611 = vmatpush.bf16.msra.mxu2 %v3071_v46  ;;  %v3113_v46 = vld [vmem:[#allocation4 + $0x5b0] sm:$0xff] }
 0x264   :  { %1449 = vmatpush.bf16.msra.mxu0 %v3053_v57  ;;  %1612 = vmatpush.bf16.msra.mxu2 %v3070_v51  ;;  %v3069_v57 = vld [vmem:[#allocation4 + $0x450] sm:$0xff]  ;;  %v3088_v51 = vld [vmem:[#allocation4 + $0x4e8] sm:$0xff] }
 0x268   :  { %1450 = vmatpush.bf16.msra.mxu0 %v3052_v59  ;;  %v1144_v59 = vperm.slane %v3312_v16, 0  ;;  %1613 = vmatpush.bf16.msra.mxu2 %v3069_v57  ;;  %v3086_v57 = vld [vmem:[#allocation4 + $0x4d8] sm:$0xff] }
 0x26c   :  { %1451 = vmatpush.bf16.msra.mxu0 %v3051_v61  ;;  %v3068_v61 = vld [vmem:[#allocation4 + $0x448] sm:$0xff] }
 0x26d   :  { %1614 = vmatpush.bf16.msra.mxu2 %v3068_v61  ;;  %v3083_v61 = vld [vmem:[#allocation4 + $0x4c0] sm:$0xff] }
 0x2cc   :  { %v782_v2 = vpop.f32.mrf.mxu0  ;;  %v1033_v3 = vpop.f32.mrf.mxu3 }
 0x2cd   :  { %v783_v4 = vadd.f32 %v782_v2, %v724_v0  ;;  %v1034_v5 = vadd.f32 %v1033_v3, %v975_v1 }
 0x2cf   :  { %v786_v6 = vadd.f32 %v783_v4, %v705_v42  ;;  %v1037_v7 = vadd.f32 %v1034_v5, %v3292_v29  ;;  %v3050_v29 = vld [vmem:[#allocation4 + $0x3b8] sm:$0xff]  ;;  %v3067_v5 = vld [vmem:[#allocation4 + $0x440] sm:$0xff] }
 0x2d0   :  { %1357 = vmatpush.bf16.msrb.mxu3 %v3050_v29  ;;  %1615 = vmatpush.bf16.msra.mxu2 %v3067_v5  ;;  %v1477_v29 = vperm.slane %v3314_v56, 1  ;;  %v3121_v5 = vld [vmem:[#allocation4 + $0x5f0] sm:$0xff] }
 0x2d1   :  { %v787_v8 = vmax.f32 %v786_v6, 0.0  ;;  %v1038_v9 = vmax.f32 %v1037_v7, 0.0  ;;  %v3043_v6 = vld [vmem:[#allocation4 + $0x380] sm:$0xff] }
 0x2d3   :  { %v788_v11 = vpack.c.bf16 %v787_v8, %v787_v8  ;;  %v1039_v54 = vpack.c.bf16 %v1038_v9, %v1038_v9 }
 0x2d4   :  { %v784_v12 = vpop.f32.mrf.mxu0  ;;  %v1035_v13 = vpop.f32.mrf.mxu3  ;;  %1358 = vmatpush.bf16.msrb.mxu3 %v3049_v31 }
 0x2d5   :  { %863 = vmatmul.bf16.vlgmr.msra.gmra.mxu1 %v788_v11  ;;  %1114 = vmatmul.bf16.vlgmr.msrb.gmra.mxu0 %v1039_v54  ;;  %v3105_v13 = vld [vmem:[#allocation4 + $0x570] sm:$0xff] }
 0x2d6   :  { %1526 = vmatpush.bf16.msra.mxu1 %v3066_v10 }
 0x2d8   :  { %1359 = vmatpush.bf16.msrb.mxu3 %v3048_v35 }
 0x2da   :  { %1527 = vmatpush.bf16.msra.mxu1 %v3065_v14  ;;  %v3082_v14 = vld [vmem:[#allocation4 + $0x4b8] sm:$0xff] }
 0x2dc   :  { %1360 = vmatpush.bf16.msrb.mxu3 %v3047_v47  ;;  %v3090_v47 = vld [vmem:[#allocation4 + $0x4f8] sm:$0xff] }
 0x2dd   :  { %1777 = vmatpush.bf16.msrb.mxu0 %v3090_v47 }
 0x2de   :  { %1528 = vmatpush.bf16.msra.mxu1 %v3064_v17  ;;  %v3081_v17 = vld [vmem:[#allocation4 + $0x4b0] sm:$0xff] }
 0x2e0   :  { %1361 = vmatpush.bf16.msrb.mxu3 %v3046_v23  ;;  %v3110_v23 = vld [vmem:[#allocation4 + $0x598] sm:$0xff] }
 0x2e2   :  { %1529 = vmatpush.bf16.msra.mxu1 %v3063_v19  ;;  %v3080_v19 = vld [vmem:[#allocation4 + $0x4a8] sm:$0xff] }
 0x2e4   :  { %1362 = vmatpush.bf16.msrb.mxu3 %v3045_v58  ;;  %v3108_v58 = vld [vmem:[#allocation4 + $0x588] sm:$0xff] }
 0x2e5   :  { %1201 = vmatmul.bf16.vlgmr.msrb.gmra.mxu1 %v3259_v37  ;;  %1452 = vmatmul.bf16.vlgmr.msra.gmra.mxu0 %v3259_v37 }
 0x2e6   :  { %1530 = vmatpush.bf16.msra.mxu1 %v3062_v21  ;;  %v3079_v21 = vld [vmem:[#allocation4 + $0x4a0] sm:$0xff] }
 0x2e8   :  { %1363 = vmatpush.bf16.msrb.mxu3 %v3044_v62  ;;  %v1559_v62 = vperm.slane %v3314_v56, 2 }
 0x2ea   :  { %1531 = vmatpush.bf16.msra.mxu1 %v3061_v53  ;;  %v3078_v53 = vld [vmem:[#allocation4 + $0x498] sm:$0xff] }
 0x2ec   :  { %1364 = vmatpush.bf16.msrb.mxu3 %v3043_v6 }
 0x2ee   :  { %1532 = vmatpush.bf16.msra.mxu1 %v3060_v25  ;;  %v3077_v25 = vld [vmem:[#allocation4 + $0x490] sm:$0xff] }
 0x2f0   :  { %1695 = vmatpush.bf16.msra.mxu3 %v3082_v14  ;;  %v3095_v14 = vld [vmem:[#allocation4 + $0x520] sm:$0xff] }
 0x2f2   :  { %1533 = vmatpush.bf16.msra.mxu1 %v3059_v27  ;;  %v3076_v27 = vld [vmem:[#allocation4 + $0x488] sm:$0xff] }
 0x2f4   :  { %1696 = vmatpush.bf16.msra.mxu3 %v3081_v17  ;;  %v3331_v17 = vld [vmem:[#allocation6 + $0x1c] sm:$0xf] }
 0x2f8   :  { %1697 = vmatpush.bf16.msra.mxu3 %v3080_v19 }
 0x2fc   :  { %1698 = vmatpush.bf16.msra.mxu3 %v3079_v21  ;;  %v3094_v21 = vld [vmem:[#allocation4 + $0x518] sm:$0xff] }
 0x300   :  { %1699 = vmatpush.bf16.msra.mxu3 %v3078_v53 }
 0x304   :  { %1700 = vmatpush.bf16.msra.mxu3 %v3077_v25 }
 0x308   :  { %1701 = vmatpush.bf16.msra.mxu3 %v3076_v27  ;;  %v3117_v27 = vld [vmem:[#allocation4 + $0x5d0] sm:$0xff] }
 0x30c   :  { %1702 = vmatpush.bf16.msra.mxu3 %v3075_v28 }
 0x352   :  { %v864_v38 = vpop.f32.mrf.mxu1  ;;  %v1115_v39 = vpop.f32.mrf.mxu0 }
 0x353   :  { %v865_v40 = vadd.f32 %v864_v38, %v806_v32  ;;  %v1116_v42 = vadd.f32 %v1115_v39, %v1057_v33  ;;  %v1226_v33 = vperm.slane %v3312_v16, 1 }
 0x355   :  { %v868_v44 = vadd.f32 %v865_v40, %v787_v8  ;;  %v1119_v45 = vadd.f32 %v1116_v42, %v1038_v9  ;;  %v3106_v9 = vld [vmem:[#allocation4 + $0x578] sm:$0xff] }
 0x357   :  { %v870_v48 = vmul.f32 %v869_v41, %v868_v44  ;;  %v1121_v49 = vmul.f32 %v1120_v43, %v1119_v45  ;;  %v3114_v43 = vld [vmem:[#allocation4 + $0x5b8] sm:$0xff] }
 0x359   :  { %v871_v50 = vadd.f32 1.0, %v870_v48  ;;  %2538 = vst [vmem:[%s3353_s5 + $0x18] sm:$0xff] %v1121_v49  ;;  %v3112_v48 = vld [vmem:[#allocation4 + $0x5a8] sm:$0xff]  ;;  %v3089_v49 = vld [vmem:[#allocation4 + $0x4f0] sm:$0xff] }
 0x35a   :  { %v866_v52 = vpop.f32.mrf.mxu1  ;;  %v1117_v55 = vpop.f32.mrf.mxu0  ;;  %1778 = vmatpush.bf16.msrb.mxu0 %v3089_v49 }
 0x35b   :  { %2441 = vst [vmem:[%s3353_s5 + $0x10] sm:$0xff] %v871_v50  ;;  %v3111_v50 = vld [vmem:[#allocation4 + $0x5a0] sm:$0xff]  ;;  %v3109_v55 = vld [vmem:[#allocation4 + $0x590] sm:$0xff] }
 0x35c   :  { %v3087_v52 = vld [vmem:[#allocation4 + $0x4e0] sm:$0xff] }
 0x35e   :  { %1779 = vmatpush.bf16.msrb.mxu0 %v3088_v51 }
 0x362   :  { %v1202_v63 = vpop.f32.mrf.mxu1  ;;  %v1453_v0 = vpop.f32.mrf.mxu0  ;;  %1780 = vmatpush.bf16.msrb.mxu0 %v3087_v52 }
 0x363   :  { %v1203_v1 = vadd.f32 %v1202_v63, %v1144_v59  ;;  %v1454_v2 = vadd.f32 %v1453_v0, %v1395_v60  ;;  %v3107_v59 = vld [vmem:[#allocation4 + $0x580] sm:$0xff]  ;;  %v3084_v60 = vld [vmem:[#allocation4 + $0x4c8] sm:$0xff]  ;;  %v3098_v63 = vld [vmem:[#allocation4 + $0x538] sm:$0xff] }
 0x364   :  { %v3122_v0 = vld [vmem:[#allocation4 + $0x5f8] sm:$0xff]  ;;  %1859 = vmatpush.bf16.msrb.mxu1 %v3098_v63 }
 0x365   :  { %v1206_v3 = vadd.f32 %v1203_v1, %v3255_v36  ;;  %v1457_v4 = vadd.f32 %v1454_v2, %v3255_v36 }
 0x366   :  { %1781 = vmatpush.bf16.msrb.mxu0 %v3086_v57 }
 0x367   :  { %v1207_v7 = vmax.f32 %v1206_v3, 0.0  ;;  %v1458_v8 = vmax.f32 %v1457_v4, 0.0  ;;  %v1622_v3 = vperm.slane %v3314_v56, 3  ;;  %v3097_v4 = vld [vmem:[#allocation4 + $0x530] sm:$0xff]  ;;  %v1371_v56 = vperm.slane %v3312_v16, 3 }
 0x368   :  { %1860 = vmatpush.bf16.msrb.mxu1 %v3097_v4 }
 0x369   :  { %v1208_v10 = vpack.c.bf16 %v1207_v7, %v1207_v7  ;;  %v1459_v11 = vpack.c.bf16 %v1458_v8, %v1458_v8 }
 0x36a   :  { %v1204_v54 = vpop.f32.mrf.mxu1  ;;  %v1455_v12 = vpop.f32.mrf.mxu0 }
 0x36b   :  { %1283 = vmatmul.bf16.vlgmr.msrb.gmra.mxu2 %v1208_v10  ;;  %1534 = vmatmul.bf16.vlgmr.msra.gmra.mxu1 %v1459_v11  ;;  %v3120_v10 = vld [vmem:[#allocation4 + $0x5e8] sm:$0xff] }
 0x36c   :  { %1946 = vmatpush.bf16.msrb.mxu2 %v3106_v9  ;;  %v3096_v9 = vld [vmem:[#allocation4 + $0x528] sm:$0xff] }
 0x36d   :  { %1861 = vmatpush.bf16.msrb.mxu1 %v3096_v9 }
 0x370   :  { %1947 = vmatpush.bf16.msrb.mxu2 %v3105_v13 }
 0x371   :  { %1862 = vmatpush.bf16.msrb.mxu1 %v3095_v14 }
 0x374   :  { %1948 = vmatpush.bf16.msrb.mxu2 %v3104_v15  ;;  %v3119_v15 = vld [vmem:[#allocation4 + $0x5e0] sm:$0xff] }
 0x375   :  { %1863 = vmatpush.bf16.msrb.mxu1 %v3094_v21 }
 0x378   :  { %1949 = vmatpush.bf16.msrb.mxu2 %v3103_v18 }
 0x37c   :  { %1950 = vmatpush.bf16.msrb.mxu2 %v3102_v20  ;;  %v1897_v20 = vperm.slane %v3331_v17, 0 }
 0x380   :  { %1951 = vmatpush.bf16.msrb.mxu2 %v3101_v22  ;;  %v3118_v22 = vld [vmem:[#allocation4 + $0x5d8] sm:$0xff] }
 0x384   :  { %1952 = vmatpush.bf16.msrb.mxu2 %v3100_v24  ;;  %v1628_v24 = vld [vmem:[#allocation6 + $0x18] sm:$0xf] }
 0x388   :  { %1953 = vmatpush.bf16.msrb.mxu2 %v3099_v26  ;;  %v3093_v26 = vld [vmem:[#allocation4 + $0x510] sm:$0xff] }
 0x389   :  { %1864 = vmatpush.bf16.msrb.mxu1 %v3093_v26 }
 0x3e8   :  { %v1535_v30 = vpop.f32.mrf.mxu1 }
 0x3e9   :  { %v1536_v31 = vadd.f32 %v1535_v30, %v1477_v29  ;;  %v1646_v29 = vperm.slane %v1628_v24, 0 }
 0x3eb   :  { %v1539_v32 = vadd.f32 %v1536_v31, %v1458_v8 }
 0x3ed   :  { %v1540_v34 = vmax.f32 %v1539_v32, 0.0 }
 0x3ee   :  { %v1284_v35 = vpop.f32.mrf.mxu2 }
 0x3ef   :  { %v1541_v38 = vpack.c.bf16 %v1540_v34, %v1540_v34  ;;  %v1285_v39 = vadd.f32 %v1284_v35, %v1226_v33 }
 0x3f0   :  { %v1537_v40 = vpop.f32.mrf.mxu1 }
 0x3f1   :  { %v1288_v41 = vadd.f32 %v1285_v39, %v1207_v7  ;;  %1616 = vmatmul.bf16.vlgmr.msra.gmra.mxu2 %v1541_v38  ;;  %v1308_v7 = vperm.slane %v3312_v16, 2 }
 0x3f3   :  { %v1289_v42 = vmax.f32 %v1288_v41, 0.0  ;;  %v3092_v41 = vld [vmem:[#allocation4 + $0x508] sm:$0xff] }
 0x3f4   :  { %1865 = vmatpush.bf16.msrb.mxu1 %v3092_v41 }
 0x3f5   :  { %v1290_v44 = vpack.c.bf16 %v1289_v42, %v1289_v42 }
 0x3f6   :  { %v1286_v45 = vpop.f32.mrf.mxu2 }
 0x3f7   :  { %1365 = vmatmul.bf16.vlgmr.msrb.gmra.mxu3 %v1290_v44  ;;  %v3115_v44 = vld [vmem:[#allocation4 + $0x5c0] sm:$0xff]  ;;  %v1728_v45 = vperm.slane %v1628_v24, 1 }
 0x3f8   :  { %2028 = vmatpush.bf16.msrb.mxu3 %v3114_v43  ;;  %v3091_v43 = vld [vmem:[#allocation4 + $0x500] sm:$0xff] }
 0x3f9   :  { %1866 = vmatpush.bf16.msrb.mxu1 %v3091_v43 }
 0x3fc   :  { %2029 = vmatpush.bf16.msrb.mxu3 %v3113_v46  ;;  %v1979_v46 = vperm.slane %v3331_v17, 1 }
 0x400   :  { %2030 = vmatpush.bf16.msrb.mxu3 %v3112_v48 }
 0x401   :  { %1954 = vmatmul.bf16.vlgmr.msrb.gmra.mxu2 %v3259_v37 }
 0x404   :  { %2031 = vmatpush.bf16.msrb.mxu3 %v3111_v50 }
 0x407   :  { %1703 = vmatmul.bf16.vlgmr.msra.gmra.mxu3 %v3259_v37  ;;  %v3085_v37 = vld [vmem:[#allocation4 + $0x4d0] sm:$0xff] }
 0x408   :  { %2032 = vmatpush.bf16.msrb.mxu3 %v3110_v23  ;;  %1782 = vmatpush.bf16.msrb.mxu0 %v3085_v37 }
 0x40c   :  { %2033 = vmatpush.bf16.msrb.mxu3 %v3109_v55  ;;  %1783 = vmatpush.bf16.msrb.mxu0 %v3084_v60  ;;  %v2061_v60 = vperm.slane %v3331_v17, 2 }
 0x410   :  { %2034 = vmatpush.bf16.msrb.mxu3 %v3108_v58  ;;  %1784 = vmatpush.bf16.msrb.mxu0 %v3083_v61 }
 0x414   :  { %2035 = vmatpush.bf16.msrb.mxu3 %v3107_v59  ;;  %2110 = vmatpush.bf16.msra.mxu0 %v3122_v0  ;;  %v1810_v59 = vperm.slane %v1628_v24, 2  ;;  %v1873_v0 = vperm.slane %v1628_v24, 3 }
 0x418   :  { %2111 = vmatpush.bf16.msra.mxu0 %v3121_v5 }
 0x41c   :  { %2112 = vmatpush.bf16.msra.mxu0 %v3120_v10 }
 0x420   :  { %2113 = vmatpush.bf16.msra.mxu0 %v3119_v15 }
 0x424   :  { %2114 = vmatpush.bf16.msra.mxu0 %v3118_v22 }
 0x428   :  { %2115 = vmatpush.bf16.msra.mxu0 %v3117_v27 }
 0x474   :  { %v1617_v1 = vpop.f32.mrf.mxu2 }
 0x475   :  { %v1618_v2 = vadd.f32 %v1617_v1, %v1559_v62 }
 0x477   :  { %v1621_v6 = vadd.f32 %v1618_v2, %v1540_v34  ;;  %v2124_v2 = vperm.slane %v3331_v17, 3 }
 0x479   :  { %v1623_v8 = vmul.f32 %v1622_v3, %v1621_v6 }
 0x47a   :  { %v1366_v11 = vpop.f32.mrf.mxu3 }
 0x47b   :  { %2732 = vst [vmem:[%s3353_s5 + $0x28] sm:$0xff] %v1623_v8  ;;  %v1367_v54 = vadd.f32 %v1366_v11, %v1308_v7 }
 0x47c   :  { %v1619_v12 = vpop.f32.mrf.mxu2 }
 0x47d   :  { %v1370_v13 = vadd.f32 %v1367_v54, %v1289_v42  ;;  %v3116_v42 = vld [vmem:[#allocation4 + $0x5c8] sm:$0xff] }
 0x47e   :  { %2116 = vmatpush.bf16.msra.mxu0 %v3116_v42 }
 0x47f   :  { %v1372_v18 = vmul.f32 %v1371_v56, %v1370_v13 }
 0x481   :  { %v1373_v19 = vadd.f32 1.0, %v1372_v18 }
 0x482   :  { %v1368_v53 = vpop.f32.mrf.mxu3  ;;  %2117 = vmatpush.bf16.msra.mxu0 %v3115_v44 }
 0x483   :  { %2635 = vst [vmem:[%s3353_s5 + $0x20] sm:$0xff] %v1373_v19 }
 0x484   :  { %v1955_v16 = vpop.f32.mrf.mxu2 }
 0x485   :  { %v1956_v25 = vadd.f32 %v1955_v16, %v1897_v20 }
 0x487   :  { %v1959_v28 = vadd.f32 %v1956_v25, %v3255_v36 }
 0x489   :  { %v1960_v30 = vmax.f32 %v1959_v28, 0.0 }
 0x48a   :  { %v1704_v31 = vpop.f32.mrf.mxu3 }
 0x48b   :  { %v1961_v32 = vpack.c.bf16 %v1960_v30, %v1960_v30  ;;  %v1705_v33 = vadd.f32 %v1704_v31, %v1646_v29 }
 0x48c   :  { %v1957_v34 = vpop.f32.mrf.mxu2 }
 0x48d   :  { %v1708_v35 = vadd.f32 %v1705_v33, %v3255_v36  ;;  %2036 = vmatmul.bf16.vlgmr.msrb.gmra.mxu3 %v1961_v32 }
 0x48f   :  { %v1709_v38 = vmax.f32 %v1708_v35, 0.0 }
 0x491   :  { %v1710_v39 = vpack.c.bf16 %v1709_v38, %v1709_v38 }
 0x492   :  { %v1706_v40 = vpop.f32.mrf.mxu3 }
 0x493   :  { %1785 = vmatmul.bf16.vlgmr.msrb.gmra.mxu0 %v1710_v39 }
 0x510   :  { %v1786_v47 = vpop.f32.mrf.mxu0  ;;  %v2037_v48 = vpop.f32.mrf.mxu3 }
 0x511   :  { %v1787_v49 = vadd.f32 %v1786_v47, %v1728_v45  ;;  %v2038_v36 = vadd.f32 %v2037_v48, %v1979_v46 }
 0x513   :  { %v1790_v50 = vadd.f32 %v1787_v49, %v1709_v38  ;;  %v2041_v51 = vadd.f32 %v2038_v36, %v1960_v30 }
 0x515   :  { %v1791_v23 = vmax.f32 %v1790_v50, 0.0  ;;  %v2042_v52 = vmax.f32 %v2041_v51, 0.0 }
 0x517   :  { %v1792_v55 = vpack.c.bf16 %v1791_v23, %v1791_v23  ;;  %v2043_v57 = vpack.c.bf16 %v2042_v52, %v2042_v52 }
 0x518   :  { %v1788_v58 = vpop.f32.mrf.mxu0  ;;  %v2039_v37 = vpop.f32.mrf.mxu3 }
 0x519   :  { %1867 = vmatmul.bf16.vlgmr.msrb.gmra.mxu1 %v1792_v55  ;;  %2118 = vmatmul.bf16.vlgmr.msra.gmra.mxu0 %v2043_v57 }
 0x596   :  { %v1868_v61 = vpop.f32.mrf.mxu1  ;;  %v2119_v62 = vpop.f32.mrf.mxu0 }
 0x597   :  { %v1869_v63 = vadd.f32 %v1868_v61, %v1810_v59  ;;  %v2120_v1 = vadd.f32 %v2119_v62, %v2061_v60 }
 0x599   :  { %v1872_v3 = vadd.f32 %v1869_v63, %v1791_v23  ;;  %v2123_v4 = vadd.f32 %v2120_v1, %v2042_v52 }
 0x59b   :  { %v1874_v5 = vmul.f32 %v1873_v0, %v1872_v3  ;;  %v2125_v6 = vmul.f32 %v2124_v2, %v2123_v4 }
 0x59d   :  { %v1875_v7 = vadd.f32 1.0, %v1874_v5  ;;  %2926 = vst [vmem:[%s3353_s5 + $0x38] sm:$0xff] %v2125_v6 }
 0x59e   :  { %v1870_v8 = vpop.f32.mrf.mxu1  ;;  %v2121_v9 = vpop.f32.mrf.mxu0 }
 0x59f   :  { %2829 = vst [vmem:[%s3353_s5 + $0x30] sm:$0xff] %v1875_v7 }
 0x5a0   :  { %2133 = vsyncpa [#allocation3], 1 }
 0x5a1   :  { %2134 = vsyncpa [#allocation5], 1 }

</bundles_post_ra>
